<compile_context>
chip_gen: v7x
topology: tpu7x:2x2x1
jax: 0.10.0
libtpu: 0.0.40
codegen_flags: <defaults>
</compile_context>

<pallas_src>
import functools

import jax
import jax.numpy as jnp
from jax.experimental import pallas as pl
from jax.experimental.pallas import tpu as pltpu

EPS = 1e-5


# ---------------------------------------------------------------------------
# In-kernel helpers
# ---------------------------------------------------------------------------
def _bn_relu_conv(x, a_ref, c_ref, w_ref, b_ref, ks, pad):
    """x: (C, L) f32 value (channels on sublanes, L on lanes).

    a/c/b refs: (C, 1) per-channel scale / shift / conv-bias.
    w ref: (ks, C_out, C_in).
    Returns conv1d(relu(x * a + c), w) + b  with 'same' padding, f32 (C, L).
    """
    C, L = x.shape
    # Folded BatchNorm affine (a = gamma*rstd, c = beta - mean*gamma*rstd) + ReLU.
    h = jnp.maximum(x * a_ref[...] + c_ref[...], 0.0)

    # Lane-index grid for boundary masking of shifted taps.
    col = jax.lax.broadcasted_iota(jnp.int32, (C, L), 1)

    acc = None
    for k in range(ks):                      # ks is static -> unrolled
        d = k - pad                          # tap offset along L
        if d == 0:
            hk = h
        else:
            # shifted[:, l] = h[:, l + d]; the wrap-around columns are zeroed
            # ('same' zero padding).  Roll rides the XLU, mask is a cheap VPU select.
            shifted = pltpu.roll(h, shift=(-d) % L, axis=1)
            valid = (col < (L - d)) if d > 0 else (col >= (-d))
            hk = jnp.where(valid, shifted, 0.0)
        # y[co, l] = sum_ci w[k, co, ci] * h[ci, l + d]   (PyTorch cross-correlation)
        y = jnp.dot(w_ref[k], hk, preferred_element_type=jnp.float32)
        acc = y if acc is None else acc + y  # first tap initializes the accumulator
    return acc + b_ref[...]


# ---------------------------------------------------------------------------
# Kernels
# ---------------------------------------------------------------------------
def _x_stats_kernel(x_ref, s_ref, ss_ref):
    """Per-sample partial sums for BN1: sum and sum-of-squares per channel."""
    x = x_ref[...].astype(jnp.float32)                    # (C, L)
    s_ref[...] = jnp.sum(x, axis=1, keepdims=True)        # (C, 1)
    ss_ref[...] = jnp.sum(x * x, axis=1, keepdims=True)   # (C, 1)


def _mid_stats_kernel(x_ref, a1_ref, c1_ref, w1_ref, b1_ref, s_ref, ss_ref, *, ks, pad):
    """Per-sample partial sums of h1 = conv1(relu(bn1(x))) for BN2 statistics."""
    h = _bn_relu_conv(x_ref[...].astype(jnp.float32),
                      a1_ref, c1_ref, w1_ref, b1_ref, ks, pad)
    s_ref[...] = jnp.sum(h, axis=1, keepdims=True)
    ss_ref[...] = jnp.sum(h * h, axis=1, keepdims=True)


def _final_kernel(x_ref, a1_ref, c1_ref, w1_ref, b1_ref,
                  a2_ref, c2_ref, w2_ref, b2_ref, o_ref, *, ks, pad):
    """Fused bn1 -> relu -> conv1 -> bn2 -> relu -> conv2 + residual, one sample per step."""
    h = _bn_relu_conv(x_ref[...].astype(jnp.float32),
                      a1_ref, c1_ref, w1_ref, b1_ref, ks, pad)
    h = _bn_relu_conv(h, a2_ref, c2_ref, w2_ref, b2_ref, ks, pad)
    # Re-read x from VMEM for the residual instead of keeping the first load live
    # across both convs (keeps vreg pressure low).
    o_ref[...] = (x_ref[...].astype(jnp.float32) + h).astype(o_ref.dtype)


# ---------------------------------------------------------------------------
# Host-side wrapper
# ---------------------------------------------------------------------------
def _bn_scale_shift(sum_c, sumsq_c, count, gamma, beta):
    """Fold training-mode BatchNorm into per-channel scale/shift (fp32)."""
    mean = sum_c[:, 0] / count                                   # (C,)
    var = jnp.maximum(sumsq_c[:, 0] / count - mean * mean, 0.0)  # biased, like torch
    a = gamma * jax.lax.rsqrt(var + EPS)
    c = beta - mean * a
    return a.reshape(-1, 1).astype(jnp.float32), c.reshape(-1, 1).astype(jnp.float32)


def resnet_forward(x_ncl, params, ks=3):
    """x_ncl: (N, C, L) float32, exactly like the PyTorch module's input."""
    assert ks % 2 == 1, "module is only shape-preserving (residual add) for odd ks"
    N, C, L = x_ncl.shape
    g1, b1, w1, cb1, g2, b2, w2, cb2 = params
    pad = (ks - 1) // 2

    # torch Conv1d weight is (C_out, C_in, ks) -> tap-major (ks, C_out, C_in) (tiny, one-off).
    w1_t = jnp.transpose(w1, (2, 0, 1))
    w2_t = jnp.transpose(w2, (2, 0, 1))
    cb1_v = cb1.reshape(C, 1)
    cb2_v = cb2.reshape(C, 1)

    cparams = pltpu.CompilerParams(
        dimension_semantics=("parallel",),        # batch axis -> megacore sharding on v7x
        vmem_limit_bytes=32 * 1024 * 1024)        # explicit budget; fits all generations

    # BlockSpecs: one (C, L) sample per grid step, per-channel params untiled.
    x_spec = pl.BlockSpec((None, C, L), lambda n: (n, 0, 0))
    vec_spec = pl.BlockSpec((C, 1), lambda n: (0, 0))
    w_spec = pl.BlockSpec((ks, C, C), lambda n: (0, 0, 0))
    stat_spec = pl.BlockSpec((None, C, 1), lambda n: (n, 0, 0))
    stat_shape = jax.ShapeDtypeStruct((N, C, 1), jnp.float32)

    # ---- Pass A: per-sample partial sums of x  -> BN1 batch statistics.
    s1, ss1 = pl.pallas_call(
        _x_stats_kernel,
        grid=(N,),
        in_specs=[x_spec],
        out_specs=(stat_spec, stat_spec),
        out_shape=(stat_shape, stat_shape),
        compiler_params=cparams,
    )(x_ncl)
    a1, c1 = _bn_scale_shift(jnp.sum(s1, axis=0), jnp.sum(ss1, axis=0), N * L, g1, b1)

    # ---- Pass B: partial sums of h1 = conv1(relu(bn1(x)))  -> BN2 batch statistics.
    s2, ss2 = pl.pallas_call(
        functools.partial(_mid_stats_kernel, ks=ks, pad=pad),
        grid=(N,),
        in_specs=[x_spec, vec_spec, vec_spec, w_spec, vec_spec],
        out_specs=(stat_spec, stat_spec),
        out_shape=(stat_shape, stat_shape),
        compiler_params=cparams,
    )(x_ncl, a1, c1, w1_t, cb1_v)
    a2, c2 = _bn_scale_shift(jnp.sum(s2, axis=0), jnp.sum(ss2, axis=0), N * L, g2, b2)

    # ---- Pass C: fused bn1->relu->conv1->bn2->relu->conv2 + residual, tiled over batch.
    out = pl.pallas_call(
        functools.partial(_final_kernel, ks=ks, pad=pad),
        grid=(N,),
        in_specs=[x_spec, vec_spec, vec_spec, w_spec, vec_spec,
                  vec_spec, vec_spec, w_spec, vec_spec],
        out_specs=pl.BlockSpec((None, C, L), lambda n: (n, 0, 0)),
        out_shape=jax.ShapeDtypeStruct((N, C, L), x_ncl.dtype),
        compiler_params=cparams,
    )(x_ncl, a1, c1, w1_t, cb1_v, a2, c2, w2_t, cb2_v)
    return out


# ---------------------------------------------------------------------------
# Pure-JAX reference (NCL layout), for validation
# ---------------------------------------------------------------------------
def resnet_ref(x_ncl, params, ks=3):
    g1, b1, w1, cb1, g2, b2, w2, cb2 = params
    pad = (ks - 1) // 2

    def bn_relu(h, g, b):
        mean = jnp.mean(h, axis=(0, 2), keepdims=True)
        var = jnp.mean((h - mean) ** 2, axis=(0, 2), keepdims=True)
        hn = (h - mean) / jnp.sqrt(var + EPS)
        return jnp.maximum(hn * g.reshape(1, -1, 1) + b.reshape(1, -1, 1), 0.0)

    def conv(h, w, b):
        y = jax.lax.conv_general_dilated(
            h, w, window_strides=(1,), padding=[(pad, pad)],
            dimension_numbers=("NCH", "OIH", "NCH"))
        return y + b.reshape(1, -1, 1)

    h = bn_relu(x_ncl, g1, b1)
    h = conv(h, w1, cb1)
    h = bn_relu(h, g2, b2)
    h = conv(h, w2, cb2)
    return x_ncl + h


def init_params(key, nin, ks=3):
    ks_ = jax.random.split(key, 8)
    g1 = 1.0 + 0.1 * jax.random.normal(ks_[0], (nin,), jnp.float32)
    b1 = 0.1 * jax.random.normal(ks_[1], (nin,), jnp.float32)
    w1 = 0.2 * jax.random.normal(ks_[2], (nin, nin, ks), jnp.float32)
    cb1 = 0.1 * jax.random.normal(ks_[3], (nin,), jnp.float32)
    g2 = 1.0 + 0.1 * jax.random.normal(ks_[4], (nin,), jnp.float32)
    b2 = 0.1 * jax.random.normal(ks_[5], (nin,), jnp.float32)
    w2 = 0.2 * jax.random.normal(ks_[6], (nin, nin, ks), jnp.float32)
    cb2 = 0.1 * jax.random.normal(ks_[7], (nin,), jnp.float32)
    return (g1, b1, w1, cb1, g2, b2, w2, cb2)


if __name__ == "__main__":
    N, C, L, KS = 4, 16, 512, 3   # L multiple of 128 -> lane-dense tiles and stores
    key = jax.random.PRNGKey(0)
    kx, kp = jax.random.split(key)
    x = jax.random.normal(kx, (N, C, L), jnp.float32)
    params = init_params(kp, C, KS)

    fwd = jax.jit(resnet_forward, static_argnames=("ks",))
    out = jax.block_until_ready(fwd(x, params, ks=KS))
    ref = jax.block_until_ready(resnet_ref(x, params, ks=KS))

    assert out.shape == (N, C, L)
    assert jnp.allclose(out, ref, rtol=1e-3, atol=1e-3), "mismatch vs pure-JAX reference"
    print("KERNEL_OK")
</pallas_src>

<mosaic_0001>
module attributes {stable_mosaic.version = 11 : i64} {
  func.func @_x_stats_kernel(%arg0: i32, %arg1: memref<1x16x512xf32, #tpu.memory_space<vmem>>, %arg2: memref<1x16x1xf32, #tpu.memory_space<vmem>>, %arg3: memref<1x16x1xf32, #tpu.memory_space<vmem>>) attributes {dimension_semantics = [#tpu.dimension_semantics<parallel>], iteration_bounds = array<i64: 4>, scalar_prefetch = 0 : i64, scratch_operands = 0 : i64, tpu.core_type = #tpu.core_type<tc>, window_params = [{transform_indices = @transform_0, window_bounds = array<i64: 1, 16, 512>}, {transform_indices = @transform_1, window_bounds = array<i64: 1, 16, 1>}, {transform_indices = @transform_2, window_bounds = array<i64: 1, 16, 1>}]} {
    %c0 = arith.constant 0 : index
    %c0_0 = arith.constant 0 : index
    %c0_1 = arith.constant 0 : index
    %0 = vector.load %arg1[%c0, %c0_0, %c0_1] : memref<1x16x512xf32, #tpu.memory_space<vmem>>, vector<1x16x512xf32>
    %1 = vector.shape_cast %0 : vector<1x16x512xf32> to vector<16x512xf32>
    %cst = arith.constant dense<0.000000e+00> : vector<16xf32>
    %2 = vector.multi_reduction <add>, %1, %cst [1] : vector<16x512xf32> to vector<16xf32>
    %3 = vector.shape_cast %2 : vector<16xf32> to vector<16x1xf32>
    %c0_2 = arith.constant 0 : index
    %c0_3 = arith.constant 0 : index
    %c0_4 = arith.constant 0 : index
    %4 = vector.load %arg2[%c0_2, %c0_3, %c0_4] : memref<1x16x1xf32, #tpu.memory_space<vmem>>, vector<1x16x1xf32>
    %5 = vector.shape_cast %4 : vector<1x16x1xf32> to vector<16x1xf32>
    %6 = vector.shape_cast %3 : vector<16x1xf32> to vector<1x16x1xf32>
    tpu.vector_store %arg2[%c0_2, %c0_3, %c0_4], %6 {strides = array<i32>} : memref<1x16x1xf32, #tpu.memory_space<vmem>>, vector<1x16x1xf32>,
    %7 = arith.mulf %1, %1 : vector<16x512xf32>
    %cst_5 = arith.constant dense<0.000000e+00> : vector<16xf32>
    %8 = vector.multi_reduction <add>, %7, %cst_5 [1] : vector<16x512xf32> to vector<16xf32>
    %9 = vector.shape_cast %8 : vector<16xf32> to vector<16x1xf32>
    %c0_6 = arith.constant 0 : index
    %c0_7 = arith.constant 0 : index
    %c0_8 = arith.constant 0 : index
    %10 = vector.load %arg3[%c0_6, %c0_7, %c0_8] : memref<1x16x1xf32, #tpu.memory_space<vmem>>, vector<1x16x1xf32>
    %11 = vector.shape_cast %10 : vector<1x16x1xf32> to vector<16x1xf32>
    %12 = vector.shape_cast %9 : vector<16x1xf32> to vector<1x16x1xf32>
    tpu.vector_store %arg3[%c0_6, %c0_7, %c0_8], %12 {strides = array<i32>} : memref<1x16x1xf32, #tpu.memory_space<vmem>>, vector<1x16x1xf32>,
    return
  }
  func.func @transform_0(%arg0: i32) -> (i32, i32, i32) {
    %c0_i32 = arith.constant 0 : i32
    %c0_i32_0 = arith.constant 0 : i32
    %c0_i32_1 = arith.constant 0 : i32
    return %arg0, %c0_i32, %c0_i32_0 : i32, i32, i32
  }
  func.func @transform_1(%arg0: i32) -> (i32, i32, i32) {
    %c0_i32 = arith.constant 0 : i32
    %c0_i32_0 = arith.constant 0 : i32
    %c0_i32_1 = arith.constant 0 : i32
    return %arg0, %c0_i32, %c0_i32_0 : i32, i32, i32
  }
  func.func @transform_2(%arg0: i32) -> (i32, i32, i32) {
    %c0_i32 = arith.constant 0 : i32
    %c0_i32_0 = arith.constant 0 : i32
    %c0_i32_1 = arith.constant 0 : i32
    return %arg0, %c0_i32, %c0_i32_0 : i32, i32, i32
  }
}

module attributes {stable_mosaic.version = 11 : i64} {
  func.func @_mid_stats_kernel(%arg0: i32, %arg1: memref<1x16x512xf32, #tpu.memory_space<vmem>>, %arg2: memref<16x1xf32, #tpu.memory_space<vmem>>, %arg3: memref<16x1xf32, #tpu.memory_space<vmem>>, %arg4: memref<3x16x16xf32, #tpu.memory_space<vmem>>, %arg5: memref<16x1xf32, #tpu.memory_space<vmem>>, %arg6: memref<1x16x1xf32, #tpu.memory_space<vmem>>, %arg7: memref<1x16x1xf32, #tpu.memory_space<vmem>>) attributes {dimension_semantics = [#tpu.dimension_semantics<parallel>], iteration_bounds = array<i64: 4>, scalar_prefetch = 0 : i64, scratch_operands = 0 : i64, tpu.core_type = #tpu.core_type<tc>, window_params = [{transform_indices = @transform_0, window_bounds = array<i64: 1, 16, 512>}, {pipeline_mode = #tpu.pipeline_mode<synchronous>, transform_indices = @transform_1, window_bounds = array<i64: 16, 1>}, {pipeline_mode = #tpu.pipeline_mode<synchronous>, transform_indices = @transform_2, window_bounds = array<i64: 16, 1>}, {pipeline_mode = #tpu.pipeline_mode<synchronous>, transform_indices = @transform_3, window_bounds = array<i64: 3, 16, 16>}, {pipeline_mode = #tpu.pipeline_mode<synchronous>, transform_indices = @transform_4, window_bounds = array<i64: 16, 1>}, {transform_indices = @transform_5, window_bounds = array<i64: 1, 16, 1>}, {transform_indices = @transform_6, window_bounds = array<i64: 1, 16, 1>}]} {
    %c0 = arith.constant 0 : index
    %c0_0 = arith.constant 0 : index
    %c0_1 = arith.constant 0 : index
    %0 = vector.load %arg1[%c0, %c0_0, %c0_1] : memref<1x16x512xf32, #tpu.memory_space<vmem>>, vector<1x16x512xf32>
    %1 = vector.shape_cast %0 : vector<1x16x512xf32> to vector<16x512xf32>
    %c0_2 = arith.constant 0 : index
    %c0_3 = arith.constant 0 : index
    %2 = vector.load %arg2[%c0_2, %c0_3] : memref<16x1xf32, #tpu.memory_space<vmem>>, vector<16x1xf32>
    %3 = vector.broadcast %2 : vector<16x1xf32> to vector<16x512xf32>
    %4 = arith.mulf %1, %3 : vector<16x512xf32>
    %c0_4 = arith.constant 0 : index
    %c0_5 = arith.constant 0 : index
    %5 = vector.load %arg3[%c0_4, %c0_5] : memref<16x1xf32, #tpu.memory_space<vmem>>, vector<16x1xf32>
    %6 = vector.broadcast %5 : vector<16x1xf32> to vector<16x512xf32>
    %7 = arith.addf %4, %6 : vector<16x512xf32>
    %cst = arith.constant 0.000000e+00 : f32
    %8 = vector.broadcast %cst : f32 to vector<16x512xf32>
    %9 = arith.maximumf %7, %8 : vector<16x512xf32>
    %10 = tpu.iota {dimensions = array<i32: 1>} : vector<16x512xi32>
    %c1_i32 = arith.constant 1 : i32
    %11 = tpu.dynamic_rotate %9 by %c1_i32 dim 1 : vector<16x512xf32>, i32 -> vector<16x512xf32>
    %c1_i32_6 = arith.constant 1 : i32
    %12 = vector.broadcast %c1_i32_6 : i32 to vector<16x512xi32>
    %13 = arith.cmpi sge, %10, %12 : vector<16x512xi32>
    %cst_7 = arith.constant 0.000000e+00 : f32
    %14 = vector.broadcast %cst_7 : f32 to vector<16x512xf32>
    %15 = arith.select %13, %11, %14 : vector<16x512xi1>, vector<16x512xf32>
    %c0_8 = arith.constant 0 : index
    %c0_9 = arith.constant 0 : index
    %c0_10 = arith.constant 0 : index
    %16 = vector.load %arg4[%c0_8, %c0_9, %c0_10] : memref<3x16x16xf32, #tpu.memory_space<vmem>>, vector<1x16x16xf32>
    %17 = vector.shape_cast %16 : vector<1x16x16xf32> to vector<16x16xf32>
    %cst_11 = arith.constant dense<0.000000e+00> : vector<16x512xf32>
    %18 = tpu.matmul %17, %15, %cst_11 {dimension_numbers = #tpu.dot_dimension_numbers<[1], [0], [0], [1], [0, 0, 1, 1], [], []>} : vector<16x16xf32>, vector<16x512xf32>, vector<16x512xf32> -> vector<16x512xf32>
    %c1 = arith.constant 1 : index
    %c0_12 = arith.constant 0 : index
    %c0_13 = arith.constant 0 : index
    %19 = vector.load %arg4[%c1, %c0_12, %c0_13] : memref<3x16x16xf32, #tpu.memory_space<vmem>>, vector<1x16x16xf32>
    %20 = vector.shape_cast %19 : vector<1x16x16xf32> to vector<16x16xf32>
    %cst_14 = arith.constant dense<0.000000e+00> : vector<16x512xf32>
    %21 = tpu.matmul %20, %9, %cst_14 {dimension_numbers = #tpu.dot_dimension_numbers<[1], [0], [0], [1], [0, 0, 1, 1], [], []>} : vector<16x16xf32>, vector<16x512xf32>, vector<16x512xf32> -> vector<16x512xf32>
    %22 = arith.addf %18, %21 : vector<16x512xf32>
    %c511_i32 = arith.constant 511 : i32
    %23 = tpu.dynamic_rotate %9 by %c511_i32 dim 1 : vector<16x512xf32>, i32 -> vector<16x512xf32>
    %c511_i32_15 = arith.constant 511 : i32
    %24 = vector.broadcast %c511_i32_15 : i32 to vector<16x512xi32>
    %25 = arith.cmpi slt, %10, %24 : vector<16x512xi32>
    %cst_16 = arith.constant 0.000000e+00 : f32
    %26 = vector.broadcast %cst_16 : f32 to vector<16x512xf32>
    %27 = arith.select %25, %23, %26 : vector<16x512xi1>, vector<16x512xf32>
    %c2 = arith.constant 2 : index
    %c0_17 = arith.constant 0 : index
    %c0_18 = arith.constant 0 : index
    %28 = vector.load %arg4[%c2, %c0_17, %c0_18] : memref<3x16x16xf32, #tpu.memory_space<vmem>>, vector<1x16x16xf32>
    %29 = vector.shape_cast %28 : vector<1x16x16xf32> to vector<16x16xf32>
    %cst_19 = arith.constant dense<0.000000e+00> : vector<16x512xf32>
    %30 = tpu.matmul %29, %27, %cst_19 {dimension_numbers = #tpu.dot_dimension_numbers<[1], [0], [0], [1], [0, 0, 1, 1], [], []>} : vector<16x16xf32>, vector<16x512xf32>, vector<16x512xf32> -> vector<16x512xf32>
    %31 = arith.addf %22, %30 : vector<16x512xf32>
    %c0_20 = arith.constant 0 : index
    %c0_21 = arith.constant 0 : index
    %32 = vector.load %arg5[%c0_20, %c0_21] : memref<16x1xf32, #tpu.memory_space<vmem>>, vector<16x1xf32>
    %33 = vector.broadcast %32 : vector<16x1xf32> to vector<16x512xf32>
    %34 = arith.addf %31, %33 : vector<16x512xf32>
    %cst_22 = arith.constant dense<0.000000e+00> : vector<16xf32>
    %35 = vector.multi_reduction <add>, %34, %cst_22 [1] : vector<16x512xf32> to vector<16xf32>
    %36 = vector.shape_cast %35 : vector<16xf32> to vector<16x1xf32>
    %c0_23 = arith.constant 0 : index
    %c0_24 = arith.constant 0 : index
    %c0_25 = arith.constant 0 : index
    %37 = vector.load %arg6[%c0_23, %c0_24, %c0_25] : memref<1x16x1xf32, #tpu.memory_space<vmem>>, vector<1x16x1xf32>
    %38 = vector.shape_cast %37 : vector<1x16x1xf32> to vector<16x1xf32>
    %39 = vector.shape_cast %36 : vector<16x1xf32> to vector<1x16x1xf32>
    tpu.vector_store %arg6[%c0_23, %c0_24, %c0_25], %39 {strides = array<i32>} : memref<1x16x1xf32, #tpu.memory_space<vmem>>, vector<1x16x1xf32>,
    %40 = arith.mulf %34, %34 : vector<16x512xf32>
    %cst_26 = arith.constant dense<0.000000e+00> : vector<16xf32>
    %41 = vector.multi_reduction <add>, %40, %cst_26 [1] : vector<16x512xf32> to vector<16xf32>
    %42 = vector.shape_cast %41 : vector<16xf32> to vector<16x1xf32>
    %c0_27 = arith.constant 0 : index
    %c0_28 = arith.constant 0 : index
    %c0_29 = arith.constant 0 : index
    %43 = vector.load %arg7[%c0_27, %c0_28, %c0_29] : memref<1x16x1xf32, #tpu.memory_space<vmem>>, vector<1x16x1xf32>
    %44 = vector.shape_cast %43 : vector<1x16x1xf32> to vector<16x1xf32>
    %45 = vector.shape_cast %42 : vector<16x1xf32> to vector<1x16x1xf32>
    tpu.vector_store %arg7[%c0_27, %c0_28, %c0_29], %45 {strides = array<i32>} : memref<1x16x1xf32, #tpu.memory_space<vmem>>, vector<1x16x1xf32>,
    return
  }
  func.func @transform_0(%arg0: i32) -> (i32, i32, i32) {
    %c0_i32 = arith.constant 0 : i32
    %c0_i32_0 = arith.constant 0 : i32
    %c0_i32_1 = arith.constant 0 : i32
    return %arg0, %c0_i32, %c0_i32_0 : i32, i32, i32
  }
  func.func @transform_1(%arg0: i32) -> (i32, i32) {
    %c0_i32 = arith.constant 0 : i32
    %c0_i32_0 = arith.constant 0 : i32
    %c0_i32_1 = arith.constant 0 : i32
    return %c0_i32, %c0_i32_0 : i32, i32
  }
  func.func @transform_2(%arg0: i32) -> (i32, i32) {
    %c0_i32 = arith.constant 0 : i32
    %c0_i32_0 = arith.constant 0 : i32
    %c0_i32_1 = arith.constant 0 : i32
    return %c0_i32, %c0_i32_0 : i32, i32
  }
  func.func @transform_3(%arg0: i32) -> (i32, i32, i32) {
    %c0_i32 = arith.constant 0 : i32
    %c0_i32_0 = arith.constant 0 : i32
    %c0_i32_1 = arith.constant 0 : i32
    %c0_i32_2 = arith.constant 0 : i32
    return %c0_i32, %c0_i32_0, %c0_i32_1 : i32, i32, i32
  }
  func.func @transform_4(%arg0: i32) -> (i32, i32) {
    %c0_i32 = arith.constant 0 : i32
    %c0_i32_0 = arith.constant 0 : i32
    %c0_i32_1 = arith.constant 0 : i32
    return %c0_i32, %c0_i32_0 : i32, i32
  }
  func.func @transform_5(%arg0: i32) -> (i32, i32, i32) {
    %c0_i32 = arith.constant 0 : i32
    %c0_i32_0 = arith.constant 0 : i32
    %c0_i32_1 = arith.constant 0 : i32
    return %arg0, %c0_i32, %c0_i32_0 : i32, i32, i32
  }
  func.func @transform_6(%arg0: i32) -> (i32, i32, i32) {
    %c0_i32 = arith.constant 0 : i32
    %c0_i32_0 = arith.constant 0 : i32
    %c0_i32_1 = arith.constant 0 : i32
    return %arg0, %c0_i32, %c0_i32_0 : i32, i32, i32
  }
}

module attributes {stable_mosaic.version = 11 : i64} {
  func.func @_final_kernel(%arg0: i32, %arg1: memref<1x16x512xf32, #tpu.memory_space<vmem>>, %arg2: memref<16x1xf32, #tpu.memory_space<vmem>>, %arg3: memref<16x1xf32, #tpu.memory_space<vmem>>, %arg4: memref<3x16x16xf32, #tpu.memory_space<vmem>>, %arg5: memref<16x1xf32, #tpu.memory_space<vmem>>, %arg6: memref<16x1xf32, #tpu.memory_space<vmem>>, %arg7: memref<16x1xf32, #tpu.memory_space<vmem>>, %arg8: memref<3x16x16xf32, #tpu.memory_space<vmem>>, %arg9: memref<16x1xf32, #tpu.memory_space<vmem>>, %arg10: memref<1x16x512xf32, #tpu.memory_space<vmem>>) attributes {dimension_semantics = [#tpu.dimension_semantics<parallel>], iteration_bounds = array<i64: 4>, scalar_prefetch = 0 : i64, scratch_operands = 0 : i64, tpu.core_type = #tpu.core_type<tc>, window_params = [{transform_indices = @transform_0, window_bounds = array<i64: 1, 16, 512>}, {pipeline_mode = #tpu.pipeline_mode<synchronous>, transform_indices = @transform_1, window_bounds = array<i64: 16, 1>}, {pipeline_mode = #tpu.pipeline_mode<synchronous>, transform_indices = @transform_2, window_bounds = array<i64: 16, 1>}, {pipeline_mode = #tpu.pipeline_mode<synchronous>, transform_indices = @transform_3, window_bounds = array<i64: 3, 16, 16>}, {pipeline_mode = #tpu.pipeline_mode<synchronous>, transform_indices = @transform_4, window_bounds = array<i64: 16, 1>}, {pipeline_mode = #tpu.pipeline_mode<synchronous>, transform_indices = @transform_5, window_bounds = array<i64: 16, 1>}, {pipeline_mode = #tpu.pipeline_mode<synchronous>, transform_indices = @transform_6, window_bounds = array<i64: 16, 1>}, {pipeline_mode = #tpu.pipeline_mode<synchronous>, transform_indices = @transform_7, window_bounds = array<i64: 3, 16, 16>}, {pipeline_mode = #tpu.pipeline_mode<synchronous>, transform_indices = @transform_8, window_bounds = array<i64: 16, 1>}, {transform_indices = @transform_9, window_bounds = array<i64: 1, 16, 512>}]} {
    %c0 = arith.constant 0 : index
    %c0_0 = arith.constant 0 : index
    %c0_1 = arith.constant 0 : index
    %0 = vector.load %arg1[%c0, %c0_0, %c0_1] : memref<1x16x512xf32, #tpu.memory_space<vmem>>, vector<1x16x512xf32>
    %1 = vector.shape_cast %0 : vector<1x16x512xf32> to vector<16x512xf32>
    %c0_2 = arith.constant 0 : index
    %c0_3 = arith.constant 0 : index
    %2 = vector.load %arg2[%c0_2, %c0_3] : memref<16x1xf32, #tpu.memory_space<vmem>>, vector<16x1xf32>
    %3 = vector.broadcast %2 : vector<16x1xf32> to vector<16x512xf32>
    %4 = arith.mulf %1, %3 : vector<16x512xf32>
    %c0_4 = arith.constant 0 : index
    %c0_5 = arith.constant 0 : index
    %5 = vector.load %arg3[%c0_4, %c0_5] : memref<16x1xf32, #tpu.memory_space<vmem>>, vector<16x1xf32>
    %6 = vector.broadcast %5 : vector<16x1xf32> to vector<16x512xf32>
    %7 = arith.addf %4, %6 : vector<16x512xf32>
    %cst = arith.constant 0.000000e+00 : f32
    %8 = vector.broadcast %cst : f32 to vector<16x512xf32>
    %9 = arith.maximumf %7, %8 : vector<16x512xf32>
    %10 = tpu.iota {dimensions = array<i32: 1>} : vector<16x512xi32>
    %c1_i32 = arith.constant 1 : i32
    %11 = tpu.dynamic_rotate %9 by %c1_i32 dim 1 : vector<16x512xf32>, i32 -> vector<16x512xf32>
    %c1_i32_6 = arith.constant 1 : i32
    %12 = vector.broadcast %c1_i32_6 : i32 to vector<16x512xi32>
    %13 = arith.cmpi sge, %10, %12 : vector<16x512xi32>
    %cst_7 = arith.constant 0.000000e+00 : f32
    %14 = vector.broadcast %cst_7 : f32 to vector<16x512xf32>
    %15 = arith.select %13, %11, %14 : vector<16x512xi1>, vector<16x512xf32>
    %c0_8 = arith.constant 0 : index
    %c0_9 = arith.constant 0 : index
    %c0_10 = arith.constant 0 : index
    %16 = vector.load %arg4[%c0_8, %c0_9, %c0_10] : memref<3x16x16xf32, #tpu.memory_space<vmem>>, vector<1x16x16xf32>
    %17 = vector.shape_cast %16 : vector<1x16x16xf32> to vector<16x16xf32>
    %cst_11 = arith.constant dense<0.000000e+00> : vector<16x512xf32>
    %18 = tpu.matmul %17, %15, %cst_11 {dimension_numbers = #tpu.dot_dimension_numbers<[1], [0], [0], [1], [0, 0, 1, 1], [], []>} : vector<16x16xf32>, vector<16x512xf32>, vector<16x512xf32> -> vector<16x512xf32>
    %c1 = arith.constant 1 : index
    %c0_12 = arith.constant 0 : index
    %c0_13 = arith.constant 0 : index
    %19 = vector.load %arg4[%c1, %c0_12, %c0_13] : memref<3x16x16xf32, #tpu.memory_space<vmem>>, vector<1x16x16xf32>
    %20 = vector.shape_cast %19 : vector<1x16x16xf32> to vector<16x16xf32>
    %cst_14 = arith.constant dense<0.000000e+00> : vector<16x512xf32>
    %21 = tpu.matmul %20, %9, %cst_14 {dimension_numbers = #tpu.dot_dimension_numbers<[1], [0], [0], [1], [0, 0, 1, 1], [], []>} : vector<16x16xf32>, vector<16x512xf32>, vector<16x512xf32> -> vector<16x512xf32>
    %22 = arith.addf %18, %21 : vector<16x512xf32>
    %c511_i32 = arith.constant 511 : i32
    %23 = tpu.dynamic_rotate %9 by %c511_i32 dim 1 : vector<16x512xf32>, i32 -> vector<16x512xf32>
    %c511_i32_15 = arith.constant 511 : i32
    %24 = vector.broadcast %c511_i32_15 : i32 to vector<16x512xi32>
    %25 = arith.cmpi slt, %10, %24 : vector<16x512xi32>
    %cst_16 = arith.constant 0.000000e+00 : f32
    %26 = vector.broadcast %cst_16 : f32 to vector<16x512xf32>
    %27 = arith.select %25, %23, %26 : vector<16x512xi1>, vector<16x512xf32>
    %c2 = arith.constant 2 : index
    %c0_17 = arith.constant 0 : index
    %c0_18 = arith.constant 0 : index
    %28 = vector.load %arg4[%c2, %c0_17, %c0_18] : memref<3x16x16xf32, #tpu.memory_space<vmem>>, vector<1x16x16xf32>
    %29 = vector.shape_cast %28 : vector<1x16x16xf32> to vector<16x16xf32>
    %cst_19 = arith.constant dense<0.000000e+00> : vector<16x512xf32>
    %30 = tpu.matmul %29, %27, %cst_19 {dimension_numbers = #tpu.dot_dimension_numbers<[1], [0], [0], [1], [0, 0, 1, 1], [], []>} : vector<16x16xf32>, vector<16x512xf32>, vector<16x512xf32> -> vector<16x512xf32>
    %31 = arith.addf %22, %30 : vector<16x512xf32>
    %c0_20 = arith.constant 0 : index
    %c0_21 = arith.constant 0 : index
    %32 = vector.load %arg5[%c0_20, %c0_21] : memref<16x1xf32, #tpu.memory_space<vmem>>, vector<16x1xf32>
    %33 = vector.broadcast %32 : vector<16x1xf32> to vector<16x512xf32>
    %34 = arith.addf %31, %33 : vector<16x512xf32>
    %c0_22 = arith.constant 0 : index
    %c0_23 = arith.constant 0 : index
    %35 = vector.load %arg6[%c0_22, %c0_23] : memref<16x1xf32, #tpu.memory_space<vmem>>, vector<16x1xf32>
    %36 = vector.broadcast %35 : vector<16x1xf32> to vector<16x512xf32>
    %37 = arith.mulf %34, %36 : vector<16x512xf32>
    %c0_24 = arith.constant 0 : index
    %c0_25 = arith.constant 0 : index
    %38 = vector.load %arg7[%c0_24, %c0_25] : memref<16x1xf32, #tpu.memory_space<vmem>>, vector<16x1xf32>
    %39 = vector.broadcast %38 : vector<16x1xf32> to vector<16x512xf32>
    %40 = arith.addf %37, %39 : vector<16x512xf32>
    %cst_26 = arith.constant 0.000000e+00 : f32
    %41 = vector.broadcast %cst_26 : f32 to vector<16x512xf32>
    %42 = arith.maximumf %40, %41 : vector<16x512xf32>
    %43 = tpu.iota {dimensions = array<i32: 1>} : vector<16x512xi32>
    %c1_i32_27 = arith.constant 1 : i32
    %44 = tpu.dynamic_rotate %42 by %c1_i32_27 dim 1 : vector<16x512xf32>, i32 -> vector<16x512xf32>
    %c1_i32_28 = arith.constant 1 : i32
    %45 = vector.broadcast %c1_i32_28 : i32 to vector<16x512xi32>
    %46 = arith.cmpi sge, %43, %45 : vector<16x512xi32>
    %cst_29 = arith.constant 0.000000e+00 : f32
    %47 = vector.broadcast %cst_29 : f32 to vector<16x512xf32>
    %48 = arith.select %46, %44, %47 : vector<16x512xi1>, vector<16x512xf32>
    %c0_30 = arith.constant 0 : index
    %c0_31 = arith.constant 0 : index
    %c0_32 = arith.constant 0 : index
    %49 = vector.load %arg8[%c0_30, %c0_31, %c0_32] : memref<3x16x16xf32, #tpu.memory_space<vmem>>, vector<1x16x16xf32>
    %50 = vector.shape_cast %49 : vector<1x16x16xf32> to vector<16x16xf32>
    %cst_33 = arith.constant dense<0.000000e+00> : vector<16x512xf32>
    %51 = tpu.matmul %50, %48, %cst_33 {dimension_numbers = #tpu.dot_dimension_numbers<[1], [0], [0], [1], [0, 0, 1, 1], [], []>} : vector<16x16xf32>, vector<16x512xf32>, vector<16x512xf32> -> vector<16x512xf32>
    %c1_34 = arith.constant 1 : index
    %c0_35 = arith.constant 0 : index
    %c0_36 = arith.constant 0 : index
    %52 = vector.load %arg8[%c1_34, %c0_35, %c0_36] : memref<3x16x16xf32, #tpu.memory_space<vmem>>, vector<1x16x16xf32>
    %53 = vector.shape_cast %52 : vector<1x16x16xf32> to vector<16x16xf32>
    %cst_37 = arith.constant dense<0.000000e+00> : vector<16x512xf32>
    %54 = tpu.matmul %53, %42, %cst_37 {dimension_numbers = #tpu.dot_dimension_numbers<[1], [0], [0], [1], [0, 0, 1, 1], [], []>} : vector<16x16xf32>, vector<16x512xf32>, vector<16x512xf32> -> vector<16x512xf32>
    %55 = arith.addf %51, %54 : vector<16x512xf32>
    %c511_i32_38 = arith.constant 511 : i32
    %56 = tpu.dynamic_rotate %42 by %c511_i32_38 dim 1 : vector<16x512xf32>, i32 -> vector<16x512xf32>
    %c511_i32_39 = arith.constant 511 : i32
    %57 = vector.broadcast %c511_i32_39 : i32 to vector<16x512xi32>
    %58 = arith.cmpi slt, %43, %57 : vector<16x512xi32>
    %cst_40 = arith.constant 0.000000e+00 : f32
    %59 = vector.broadcast %cst_40 : f32 to vector<16x512xf32>
    %60 = arith.select %58, %56, %59 : vector<16x512xi1>, vector<16x512xf32>
    %c2_41 = arith.constant 2 : index
    %c0_42 = arith.constant 0 : index
    %c0_43 = arith.constant 0 : index
    %61 = vector.load %arg8[%c2_41, %c0_42, %c0_43] : memref<3x16x16xf32, #tpu.memory_space<vmem>>, vector<1x16x16xf32>
    %62 = vector.shape_cast %61 : vector<1x16x16xf32> to vector<16x16xf32>
    %cst_44 = arith.constant dense<0.000000e+00> : vector<16x512xf32>
    %63 = tpu.matmul %62, %60, %cst_44 {dimension_numbers = #tpu.dot_dimension_numbers<[1], [0], [0], [1], [0, 0, 1, 1], [], []>} : vector<16x16xf32>, vector<16x512xf32>, vector<16x512xf32> -> vector<16x512xf32>
    %64 = arith.addf %55, %63 : vector<16x512xf32>
    %c0_45 = arith.constant 0 : index
    %c0_46 = arith.constant 0 : index
    %65 = vector.load %arg9[%c0_45, %c0_46] : memref<16x1xf32, #tpu.memory_space<vmem>>, vector<16x1xf32>
    %66 = vector.broadcast %65 : vector<16x1xf32> to vector<16x512xf32>
    %67 = arith.addf %64, %66 : vector<16x512xf32>
    %c0_47 = arith.constant 0 : index
    %c0_48 = arith.constant 0 : index
    %c0_49 = arith.constant 0 : index
    %68 = vector.load %arg1[%c0_47, %c0_48, %c0_49] : memref<1x16x512xf32, #tpu.memory_space<vmem>>, vector<1x16x512xf32>
    %69 = vector.shape_cast %68 : vector<1x16x512xf32> to vector<16x512xf32>
    %70 = arith.addf %69, %67 : vector<16x512xf32>
    %c0_50 = arith.constant 0 : index
    %c0_51 = arith.constant 0 : index
    %c0_52 = arith.constant 0 : index
    %71 = vector.load %arg10[%c0_50, %c0_51, %c0_52] : memref<1x16x512xf32, #tpu.memory_space<vmem>>, vector<1x16x512xf32>
    %72 = vector.shape_cast %71 : vector<1x16x512xf32> to vector<16x512xf32>
    %73 = vector.shape_cast %70 : vector<16x512xf32> to vector<1x16x512xf32>
    tpu.vector_store %arg10[%c0_50, %c0_51, %c0_52], %73 {strides = array<i32>} : memref<1x16x512xf32, #tpu.memory_space<vmem>>, vector<1x16x512xf32>,
    return
  }
  func.func @transform_0(%arg0: i32) -> (i32, i32, i32) {
    %c0_i32 = arith.constant 0 : i32
    %c0_i32_0 = arith.constant 0 : i32
    %c0_i32_1 = arith.constant 0 : i32
    return %arg0, %c0_i32, %c0_i32_0 : i32, i32, i32
  }
  func.func @transform_1(%arg0: i32) -> (i32, i32) {
    %c0_i32 = arith.constant 0 : i32
    %c0_i32_0 = arith.constant 0 : i32
    %c0_i32_1 = arith.constant 0 : i32
    return %c0_i32, %c0_i32_0 : i32, i32
  }
  func.func @transform_2(%arg0: i32) -> (i32, i32) {
    %c0_i32 = arith.constant 0 : i32
    %c0_i32_0 = arith.constant 0 : i32
    %c0_i32_1 = arith.constant 0 : i32
    return %c0_i32, %c0_i32_0 : i32, i32
  }
  func.func @transform_3(%arg0: i32) -> (i32, i32, i32) {
    %c0_i32 = arith.constant 0 : i32
    %c0_i32_0 = arith.constant 0 : i32
    %c0_i32_1 = arith.constant 0 : i32
    %c0_i32_2 = arith.constant 0 : i32
    return %c0_i32, %c0_i32_0, %c0_i32_1 : i32, i32, i32
  }
  func.func @transform_4(%arg0: i32) -> (i32, i32) {
    %c0_i32 = arith.constant 0 : i32
    %c0_i32_0 = arith.constant 0 : i32
    %c0_i32_1 = arith.constant 0 : i32
    return %c0_i32, %c0_i32_0 : i32, i32
  }
  func.func @transform_5(%arg0: i32) -> (i32, i32) {
    %c0_i32 = arith.constant 0 : i32
    %c0_i32_0 = arith.constant 0 : i32
    %c0_i32_1 = arith.constant 0 : i32
    return %c0_i32, %c0_i32_0 : i32, i32
  }
  func.func @transform_6(%arg0: i32) -> (i32, i32) {
    %c0_i32 = arith.constant 0 : i32
    %c0_i32_0 = arith.constant 0 : i32
    %c0_i32_1 = arith.constant 0 : i32
    return %c0_i32, %c0_i32_0 : i32, i32
  }
  func.func @transform_7(%arg0: i32) -> (i32, i32, i32) {
    %c0_i32 = arith.constant 0 : i32
    %c0_i32_0 = arith.constant 0 : i32
    %c0_i32_1 = arith.constant 0 : i32
    %c0_i32_2 = arith.constant 0 : i32
    return %c0_i32, %c0_i32_0, %c0_i32_1 : i32, i32, i32
  }
  func.func @transform_8(%arg0: i32) -> (i32, i32) {
    %c0_i32 = arith.constant 0 : i32
    %c0_i32_0 = arith.constant 0 : i32
    %c0_i32_1 = arith.constant 0 : i32
    return %c0_i32, %c0_i32_0 : i32, i32
  }
  func.func @transform_9(%arg0: i32) -> (i32, i32, i32) {
    %c0_i32 = arith.constant 0 : i32
    %c0_i32_0 = arith.constant 0 : i32
    %c0_i32_1 = arith.constant 0 : i32
    return %arg0, %c0_i32, %c0_i32_0 : i32, i32, i32
  }
}

</mosaic_0001>

<bundles_post_ra>
// kernel: resnet_forward.3
= control target key start
LH: loop header
LB: loop body
LE: loop exit
PB: predicated region body
PF: predicated region fallthrough
CT: control target
= control target key end

     0   :  { %8 = vsyncpa [#allocation3], 0  ;;  %s571_s0 = inlined_call_operand.hbm [shape: f32[4,16,512], index: 0, kind: input, shape index: {}]   ;;  %s572_s1 = inlined_call_operand.vmem [shape: f32[4,16,1], index: 1, kind: output, shape index: {0}]   ;;  %s573_s2 = inlined_call_operand.vmem [shape: f32[4,16,1], index: 2, kind: output, shape index: {1}]  }
   0x1   :  { %10 = vsyncpa [#allocation3 + $0x1], 0  ;;  %s460_s9 = smov 0   ;;  %s462_s10 = smov 0  }
   0x2   :  { %s464_s11 = smov 0   ;;  %s466_s12 = smov 0  }
   0x3 LB: > { %s479_s13 = sadd.s32 4294967295, %s440_s12   ;;  %s482_s14 = sadd.s32 1, %s440_s12   ;;  %s440_s12 = sphi %s466_s12, %s580_s12   ;;  %s436_s11 = sphi %s464_s11, %s579_s11   ;;  %s432_s10 = sphi %s462_s10, %s578_s10   ;;  %s428_s9 = sphi %s460_s9, %s577_s9  }
   0x4   : > { %s20_s15 = ssub.s32 %s440_s12, %s482_s14  ;;  %s23_s16 = sadd.s32 1, %s436_s11 }
   0x5   : > { %p21_p0 = scmp.eq.s32.totalorder %s20_s15, 0  ;;  %p30_p1 = scmp.ne.s32.totalorder %s436_s11, %s432_s10 }
   0x6   : > { %p31_p2 = scmp.eq.s32.totalorder %s440_s12, 0  ;;  %p36_p3 = scmp.ne.s32.totalorder %s432_s10, %s428_s9 }
   0x7   : > { %s492_s17 = scalar_select %p21_p0, %s436_s11, %s23_s16  }
   0x8   : > { %p32_p4 = por %p31_p2, %p30_p1  ;;  %p37_p5 = scmp.eq.s32.totalorder %s479_s13, 0 }
   0x9   : > { %p341_p6 = scmp.lt.s32.totalorder %s440_s12, 4  ;;  %s112_s19 = sand.u32 1, %s436_s11  }
   0xa   : > { %p496_p7 = por %p37_p5, %p36_p3  ;;  %s321_s20 = sshll.u32 %s112_s19, 6 }
   0xb   : > { %s332_s21 = sshll.u32 %s440_s12, 10  ;;  %s116_s25 = scalar_lea.vmem [#allocation2], %s321_s20 }
   0xc   : > { %s505_s24 = scalar_lea.hbm %s571_s0, %s332_s21  ;;  %s123_s26 = sshll.u32 %s116_s25, 4  ;;  %s507_s26 = int_to_ptr.vmem [resolvable:$true] %s123_s26 }
   0xd   : > { %p509_p8 = pnand %p341_p6, %p32_p4  ;;  %s514_s28 = scalar_lea.sflag [#allocation3], %s112_s19 }
   0xe   : > { %s376_s29 = scalar_lea.hbm %s505_s24, 1024  ;;  %s381_s4 = scalar_lea.hbm %s571_s0, 4096 }
   0xf   : > { %p377_p10 = scmp.ne.s32.totalorder %s505_s24, %s376_s29  ;;  %p378_p11 = pneg %p509_p8 }
  0x10   : > { %p382_p0 = scmp.lt.u32.totalorder %s505_s24, %s571_s0  ;;  %p383_p1 = scmp.lt.u32.totalorder %s381_s4, %s376_s29 }
  0x11   : > { %p379_p12 = pnand %p378_p11, %p377_p10  ;;  %p385_p3 = scmp.lt.u32.totalorder %s376_s29, %s505_s24 }
  0x12   : > { %p384_p2 = por %p383_p1, %p382_p0 }
  0x13   : > { %p380_p13 = pneg %p379_p12 }
  0x14   : > { %p386_p4 = por %p385_p3, %p384_p2 }
  0x16   : > { %p387_p5 = pnand %p386_p4, %p380_p13 }
  0x18   : > { %390 = shalt.err (!%p387_p5)
}
  0x19   : > { %s391_s7 = scalar_lea.vmem %s507_s26, 1024  ;;  %s442_s8 = smov [#allocation2]  }
  0x1a   : > { %p392_p6 = scmp.ne.s32.totalorder %s507_s26, %s391_s7  ;;  %s396_s9 = sshll.u32 %s442_s8, 4  ;;  %s397_s9 = int_to_ptr.vmem [resolvable:$false] %s396_s9 }
  0x1b   : > { %s398_s15 = scalar_lea.vmem %s397_s9, 2048  ;;  %p399_p9 = scmp.lt.s32.totalorder %s507_s26, %s397_s9 }
  0x1c   : > { %p394_p10 = pnand %p392_p6, %p378_p11  ;;  %p400_p0 = scmp.lt.s32.totalorder %s398_s15, %s391_s7 }
  0x1e   : > { %p395_p12 = pneg %p394_p10  ;;  %p401_p1 = por %p400_p0, %p399_p9 }
  0x20   : > { %p402_p2 = pnand %p401_p1, %p395_p12 }
  0x22   : > { %405 = shalt.err (!%p402_p2)
}
  0x23   : > { %s443_s16 = smov 512   ;;  %s444_s19 = smov 32  }
  0x24   : > { %340 = dma.hbm_to_vmem [thread:$0]  (!%p509_p8), %s505_s24, 1024, %s507_s26, %s514_s28, %s443_s16, %s443_s16, %s444_s19  }
  0x25   : > { %p131_p11 = scmp.lt.s32.totalorder %s440_s12, 5  ;;  %p576_p13 = scmp.ge.s32.totalorder %s440_s12, 1 }
  0x27   : > { %p132_p3 = pnand %p576_p13, %p131_p11 }
  0x28   : > { %s137_s20 = sand.u32 (!%p132_p3), 1, %s432_s10  }
  0x29   : > { %135 = sbr.rel (%p132_p3) target bundleno = 205 (0xcd), region = 24  ;;  %s325_s21 = sshll.u32 (!%p132_p3), %s137_s20, 6 }
  0x2a   : > { %s138_s22 = scalar_lea.sflag (!%p132_p3), [#allocation3], %s137_s20  ;;  %s141_s23 = scalar_lea.vmem (!%p132_p3), [#allocation2], %s325_s21 }
  0x30   : > { %423 = dma.done.wait (%p496_p7), %s138_s22, 1024  }
  0x31   : > { %425 = vsyncadd (%p496_p7), %s138_s22, 4294966272  ;;  %v177_v0 = vld [vmem:[%s141_s23] sm:$0xff]  ;;  %v178_v1 = vld [vmem:[%s141_s23 + $0x8] sm:$0xff]  ;;  %p167_p7 = scmp.lt.s32.totalorder %s479_s13, 3  ;;  %vm195_vm0 = vcmask 7168  }
  0x32   : > { %v179_v2 = vld [vmem:[%s141_s23 + $0x10] sm:$0xff]  ;;  %v180_v3 = vld [vmem:[%s141_s23 + $0x18] sm:$0xff]  ;;  %v198_v4 = vmul.f32 %v177_v0, %v177_v0  ;;  %v199_v5 = vmul.f32 %v178_v1, %v178_v1  ;;  %v185_v7 = vadd.f32 %v178_v1, %v177_v0  ;;  %v181_v8 = vld [vmem:[%s141_s23 + $0x20] sm:$0xff] }
  0x33   : > { %v200_v6 = vmul.f32 %v179_v2, %v179_v2  ;;  %v182_v9 = vld [vmem:[%s141_s23 + $0x28] sm:$0xff]  ;;  %v183_v10 = vld [vmem:[%s141_s23 + $0x30] sm:$0xff]  ;;  %v184_v11 = vld [vmem:[%s141_s23 + $0x38] sm:$0xff]  ;;  %v202_v12 = vmul.f32 %v181_v8, %v181_v8  ;;  %v201_v15 = vmul.f32 %v180_v3, %v180_v3  ;;  %s582_s13 = smov (!%p167_p7, %s479_s13), 3 }
  0x34   : > { %v203_v13 = vmul.f32 %v182_v9, %v182_v9  ;;  %v190_v14 = vadd.f32 %v182_v9, %v181_v8  ;;  %v206_v16 = vadd.f32 %v199_v5, %v198_v4  ;;  %v186_v17 = vadd.f32 %v185_v7, %v179_v2  ;;  %s333_s12 = sshll.u32 %s582_s13, 4 }
  0x35   : > { %v204_v18 = vmul.f32 %v183_v10, %v183_v10  ;;  %v205_v23 = vmul.f32 %v184_v11, %v184_v11  ;;  %s171_s25 = scalar_lea.vmem %s572_s1, %s333_s12  ;;  %s176_s28 = scalar_lea.vmem %s573_s2, %s333_s12 }
  0x36   : > { %v211_v19 = vadd.f32 %v203_v13, %v202_v12  ;;  %v191_v20 = vadd.f32 %v190_v14, %v183_v10  ;;  %v207_v21 = vadd.f32 %v206_v16, %v200_v6  ;;  %v187_v22 = vadd.f32 %v186_v17, %v180_v3 }
  0x38   : > { %v212_v24 = vadd.f32 %v211_v19, %v204_v18  ;;  %v208_v25 = vadd.f32 %v207_v21, %v201_v15  ;;  %188 = vadd.xlane.f32.xlu0 %v187_v22  ;;  %v192_v26 = vadd.f32 %v191_v20, %v184_v11 }
  0x3a   : > { %209 = vadd.xlane.f32.xlu1 %v208_v25  ;;  %v213_v27 = vadd.f32 %v212_v24, %v205_v23 }
  0x3c   : > { %193 = vadd.xlane.f32.xlu0 %v192_v26 }
  0x3e   : > { %214 = vadd.xlane.f32.xlu1 %v213_v27 }
  0xc5   : > { %v189_v28 = vpop.xlane.xlu0 %188 }
  0xc6   : > { %196 = vst.msk [vmem:[%s171_s25] sm:$0xff] %vm195_vm0, %v189_v28 }
  0xc7   : > { %v210_v29 = vpop.xlane.xlu1 %209 }
  0xc8   : > { %216 = vst.msk [vmem:[%s176_s28] sm:$0xff] %vm195_vm0, %v210_v29 }
  0xc9   : > { %v194_v30 = vpop.xlane.xlu0 %193 }
  0xca   : > { %197 = vst.msk [vmem:[%s171_s25 + $0x8] sm:$0xff] %vm195_vm0, %v194_v30 }
  0xcb   : > { %v215_v31 = vpop.xlane.xlu1 %214 }
  0xcc   : > { %217 = vst.msk [vmem:[%s176_s28 + $0x8] sm:$0xff] %vm195_vm0, %v215_v31 }
  0xcd PF: > { %p13_p8 = scmp.ge.s32.totalorder %s482_s14, 6   ;;  %s577_s9 = smov %s432_s10 }
  0xce   : > { %s578_s10 = smov %s436_s11  ;;  %s579_s11 = smov %s492_s17 }
  0xcf   : > { %s580_s12 = smov %s482_s14  ;;  %15 = sbr.rel (!%p13_p8) target bundleno = 3 (0x3), region = 76 }
  0xd6   :  { %255 = vsyncpa [#allocation3], 1 }
  0xd7   :  { %257 = vsyncpa [#allocation3 + $0x1], 1 }

// kernel: resnet_forward.4
= control target key start
LH: loop header
LB: loop body
LE: loop exit
PB: predicated region body
PF: predicated region fallthrough
CT: control target
= control target key end

     0   :  { %s1217_s21 = smov 0   ;;  %s1339_s0 = inlined_call_operand.vmem [shape: f32[4,16,512], index: 0, kind: input, shape index: {}]   ;;  %s1340_s1 = inlined_call_operand.vmem [shape: f32[16,1], index: 1, kind: input, shape index: {}]   ;;  %s1341_s2 = inlined_call_operand.vmem [shape: f32[16,1], index: 2, kind: input, shape index: {}]   ;;  %s1342_s3 = inlined_call_operand.vmem [shape: f32[3,16,16], index: 3, kind: input, shape index: {}]   ;;  %s1343_s4 = inlined_call_operand.vmem [shape: f32[16,1], index: 4, kind: input, shape index: {}]   ;;  %s1344_s5 = inlined_call_operand.vmem [shape: f32[4,16,1], index: 5, kind: output, shape index: {0}]   ;;  %s1345_s6 = inlined_call_operand.vmem [shape: f32[4,16,1], index: 6, kind: output, shape index: {1}]  }
   0x1 LB: > { %s1038_s22 = sadd.s32 4294967295, %s1176_s21   ;;  %p1042_p0 = scmp.ge.s32.totalorder %s1176_s21, 1  ;;  %s1176_s21 = sphi %s1217_s21, %s17_s21  }
   0x2   : > { %p215_p1 = scmp.lt.s32.totalorder %s1176_s21, 5 }
   0x4   : > { %p216_p2 = pnand %p1042_p0, %p215_p1 }
   0x5   : > { %v293_v0 = vld [vmem:[%s1341_s2] sm:$0xff] (!%p216_p2)  ;;  %v1178_v2 = vmov (!%p216_p2), 0   ;;  %v294_v3 = vld [vmem:[%s1341_s2 + $0x8] sm:$0xff] (!%p216_p2)  ;;  %p250_p3 = scmp.lt.s32.totalorder (!%p216_p2), %s1038_s22, 3  ;;  %v1179_v19 = vmov (!%p216_p2), 0.0   ;;  %s1180_s11 = smov (!%p216_p2), 1   ;;  %v321_v54 = vlaneseq (!%p216_p2) }
   0x6   : > { %219 = sbr.rel (%p216_p2) target bundleno = 655 (0x28f), region = 40  ;;  %v273_v1 = vld [vmem:[%s1340_s1] sm:$0xff] (!%p216_p2)  ;;  %1129 = vset.pattern.permute.xlu1 (!%p216_p2), %v1178_v2  ;;  %1128 = vset.pattern.permute.xlu0 (!%p216_p2), %v1178_v2  ;;  %v274_v4 = vld [vmem:[%s1340_s1 + $0x8] sm:$0xff] (!%p216_p2)  ;;  %v1049_v49 = vld [vmem:[%s1342_s3 + $0x10] sm:$0xff] (!%p216_p2)  ;;  %vm368_vm0 = vcmask (!%p216_p2), 130048   ;;  %s1181_s16 = smov (!%p216_p2), 127  }
   0x7   : > { %297 = vperm.xlu1 (!%p216_p2), %1129, %v293_v0   ;;  %277 = vperm.xlu0 (!%p216_p2), %1128, %v273_v1   ;;  %v1050_v51 = vld [vmem:[%s1342_s3 + $0x18] sm:$0xff] (!%p216_p2)  ;;  %v898_v52 = vld [vmem:[%s1343_s4 + $0x8] sm:$0xff] (!%p216_p2)  ;;  %v897_v53 = vld [vmem:[%s1343_s4] sm:$0xff] (!%p216_p2)  ;;  %v1265_v55 = vand.u32 (!%p216_p2), 127, %v321_v54  ;;  %vm927_vm7 = vcmask (!%p216_p2), 7168  }
   0x8   : > { %439 = vmatprep.mubr.f32.mxu0 (!%p216_p2), %v1179_v19  ;;  %516 = vmatprep.mubr.f32.mxu1 (!%p216_p2), %v1179_v19 }
   0x9   : > { %vm342_vm1 = vcmp.lt.s32.totalorder (!%p216_p2), %v1265_v55, 1  ;;  %vm351_vm2 = vcmp.ge.s32.totalorder (!%p216_p2), %v1265_v55, 1  ;;  %vm705_vm3 = vcmp.lt.s32.totalorder (!%p216_p2), %v1265_v55, 127 }
   0xa   : > { %vm1085_vm4 = vmpackc.low (!%p216_p2), %vm351_vm2, %vm351_vm2 }
   0xb   : > { %302 = vperm.xlu1 (!%p216_p2), %1129, %v294_v3   ;;  %282 = vperm.xlu0 (!%p216_p2), %1128, %v274_v4  }
   0xd   : > { %s1347_s22 = smov (!%p250_p3, %s1038_s22), 3 }
   0xe   : > { %s1071_s7 = sshll.u32 %s1347_s22, 6 }
   0xf   : > { %s254_s10 = scalar_lea.vmem %s1339_s0, %s1071_s7  ;;  %s1072_s7 = sshll.u32 %s1347_s22, 4 }
  0x10   : > { %v265_v5 = vld [vmem:[%s254_s10] sm:$0xff]  ;;  %v266_v6 = vld [vmem:[%s254_s10 + $0x8] sm:$0xff]  ;;  %v267_v7 = vld [vmem:[%s254_s10 + $0x10] sm:$0xff]  ;;  %s264_s13 = scalar_lea.vmem %s1345_s6, %s1072_s7 }
  0x11   : > { %v268_v8 = vld [vmem:[%s254_s10 + $0x18] sm:$0xff]  ;;  %v269_v15 = vld [vmem:[%s254_s10 + $0x20] sm:$0xff]  ;;  %v270_v16 = vld [vmem:[%s254_s10 + $0x28] sm:$0xff] }
  0x12   : > { %v271_v17 = vld [vmem:[%s254_s10 + $0x30] sm:$0xff]  ;;  %v272_v18 = vld [vmem:[%s254_s10 + $0x38] sm:$0xff]  ;;  %s259_s10 = scalar_lea.vmem %s1344_s5, %s1072_s7 }
  0x86   : > { %v298_v9 = vpop.permute.xlu1 %297  ;;  %v278_v10 = vpop.permute.xlu0 %277 }
  0x87   : > { %v285_v11 = vmul.f32 %v278_v10, %v265_v5  ;;  %v286_v12 = vmul.f32 %v278_v10, %v266_v6  ;;  %v287_v13 = vmul.f32 %v278_v10, %v267_v7  ;;  %v288_v14 = vmul.f32 %v278_v10, %v268_v8 }
  0x89   : > { %v305_v21 = vadd.f32 %v298_v9, %v285_v11  ;;  %v306_v22 = vadd.f32 %v298_v9, %v286_v12  ;;  %v308_v28 = vadd.f32 %v298_v9, %v288_v14  ;;  %v307_v29 = vadd.f32 %v298_v9, %v287_v13 }
  0x8a   : > { %v283_v20 = vpop.permute.xlu0 %282  ;;  %v303_v25 = vpop.permute.xlu1 %302 }
  0x8b   : > { %v289_v23 = vmul.f32 %v283_v20, %v269_v15  ;;  %v290_v24 = vmul.f32 %v283_v20, %v270_v16  ;;  %v291_v26 = vmul.f32 %v283_v20, %v271_v17  ;;  %v292_v27 = vmul.f32 %v283_v20, %v272_v18 }
  0x8c   : > { %v313_v34 = vmax.f32 %v305_v21, 0.0  ;;  %v314_v35 = vmax.f32 %v306_v22, 0.0  ;;  %v316_v38 = vmax.f32 %v308_v28, 0.0  ;;  %v315_v40 = vmax.f32 %v307_v29, 0.0 }
  0x8d   : > { %v309_v30 = vadd.f32 %v303_v25, %v289_v23  ;;  %v310_v31 = vadd.f32 %v303_v25, %v290_v24  ;;  %v312_v32 = vadd.f32 %v303_v25, %v292_v27  ;;  %v311_v33 = vadd.f32 %v303_v25, %v291_v26  ;;  %v363_v24 = vld [vmem:[%s1342_s3] sm:$0xff] }
  0x8e   : > { %v325_v23 = vadd.s32 384, %v1265_v55 }
  0x8f   : > { %v317_v36 = vmax.f32 %v309_v30, 0.0  ;;  %v318_v37 = vmax.f32 %v310_v31, 0.0  ;;  %v320_v39 = vmax.f32 %v312_v32, 0.0  ;;  %v319_v41 = vmax.f32 %v311_v33, 0.0 }
  0x90   : > { %vm717_vm5 = vcmp.lt.s32.totalorder %v325_v23, 511 }
  0x91   : > { %v1135_v42 = vpack.i.bf16 %v318_v37, %v314_v35  ;;  %v1074_v43 = vpack.c.bf16 %v318_v37, %v314_v35  ;;  %v1130_v44 = vpack.i.bf16 %v317_v36, %v313_v34  ;;  %v1076_v45 = vpack.c.bf16 %v317_v36, %v313_v34  ;;  %v364_v36 = vld [vmem:[%s1342_s3 + $0x8] sm:$0xff]  ;;  %vm1096_vm6 = vmpackc.low %vm717_vm5, %vm717_vm5 }
  0x92   : > { %v1078_v46 = vpack.c.bf16 %v320_v39, %v316_v38  ;;  %v1080_v47 = vpack.c.bf16 %v319_v41, %v315_v40  ;;  %v1145_v48 = vpack.i.bf16 %v319_v41, %v315_v40  ;;  %v1140_v50 = vpack.i.bf16 %v320_v39, %v316_v38 }
  0x93   : > { %1136 = vrot.lane.b32.xlu1 %v1135_v42, %s1180_s11  ;;  %1075 = vmatprep.subr.bf16.mxu0 %v1074_v43 }
  0x94   : > { %1079 = vmatprep.subr.bf16.mxu1 %v1078_v46  ;;  %1131 = vrot.lane.b32.xlu0 %v1130_v44, %s1180_s11 }
  0x95   : > { %1077 = vmatpush1.bf16.msra.mxu0 %v1076_v45  ;;  %1081 = vmatpush1.bf16.msra.mxu1 %v1080_v47  ;;  %v1062_v45 = vld [vmem:[%s1342_s3 + $0x28] sm:$0xff] }
  0x97   : > { %1146 = vrot.lane.b32.xlu1 %v1145_v48, %s1180_s11 }
  0x98   : > { %1141 = vrot.lane.b32.xlu0 %v1140_v50, %s1180_s11  ;;  %1051 = vmatmul.mubr.msk.f32.vlgmr.msra.gmra.mrb[0].mxu0 %vm368_vm0, %v1049_v49 }
  0x99   : > { %1053 = vmatmul.mubr.msk.f32.vlgmr.msra.gmra.mrb[0].mxu1 %vm368_vm0, %v1049_v49  ;;  %445 = vmatprep.mubr.f32.mxu0 %v1179_v19 }
  0x9a   : > { %522 = vmatprep.mubr.f32.mxu1 %v1179_v19 }
  0x9b   : > { %1156 = vrot.lane.b32.xlu1 %v1145_v48, %s1181_s16 }
  0x9c   : > { %1151 = vrot.lane.b32.xlu0 %v1135_v42, %s1181_s16  ;;  %1052 = vmatmul.mubr.msk.f32.gmra.mrb[2].mxu0 %vm368_vm0, %v1050_v51 }
  0x9d   : > { %1054 = vmatmul.mubr.msk.f32.gmra.mrb[2].mxu1 %vm368_vm0, %v1050_v51  ;;  %599 = vmatprep.mubr.f32.mxu0 %v1179_v19 }
  0x9e   : > { %676 = vmatprep.mubr.f32.mxu1 %v1179_v19 }
  0x9f   : > { %1166 = vrot.lane.b32.xlu1 %v1140_v50, %s1181_s16 }
  0xa0   : > { %1161 = vrot.lane.b32.xlu0 %v1130_v44, %s1181_s16  ;;  %v1061_v44 = vld [vmem:[%s1342_s3 + $0x20] sm:$0xff] }
  0xa3   : > { %906 = vperm.xlu1 %1129, %v898_v52  }
  0xa4   : > { %901 = vperm.xlu0 %1128, %v897_v53  }
 0x105   : > { %v1137_v56 = vpop.permute.xlu1 %1136 }
 0x106   : > { %v1139_v57 = vunpack.i.h.bf16 %v1137_v56  ;;  %v1138_v58 = vunpack.i.l.bf16 %v1137_v56  ;;  %v1132_v59 = vpop.permute.xlu0 %1131 }
 0x107   : > { %v1134_v60 = vunpack.i.h.bf16 %v1132_v59  ;;  %v1133_v61 = vunpack.i.l.bf16 %v1132_v59 }
 0x109   : > { %v1147_v62 = vpop.permute.xlu1 %1146  ;;  %v347_v63 = vsel %vm342_vm1, %v1133_v61, %v1138_v58  ;;  %v348_v0 = vsel %vm342_vm1, %v1134_v60, %v1139_v57 }
 0x10a   : > { %v1149_v1 = vunpack.i.h.bf16 %v1147_v62  ;;  %v1148_v2 = vunpack.i.l.bf16 %v1147_v62  ;;  %v1142_v3 = vpop.permute.xlu0 %1141  ;;  %v1082_v4 = vpack.c.bf16 %v348_v0, %v347_v63 }
 0x10b   : > { %v1144_v5 = vunpack.i.h.bf16 %v1142_v3  ;;  %v1143_v6 = vunpack.i.l.bf16 %v1142_v3 }
 0x10c   : > { %v345_v7 = vsel %vm342_vm1, %v1138_v58, %v1148_v2  ;;  %v346_v8 = vsel %vm342_vm1, %v1139_v57, %v1149_v1  ;;  %1083 = vmatprep.subr.bf16.mxu0 %v1082_v4 }
 0x10d   : > { %v1089_v9 = vpack.c.bf16 %v346_v8, %v345_v7  ;;  %v349_v10 = vsel %vm342_vm1, %v1143_v6, %v1133_v61  ;;  %v350_v11 = vsel %vm342_vm1, %v1144_v5, %v1134_v60  ;;  %v1157_v12 = vpop.permute.xlu1 %1156  ;;  %v343_v13 = vsel %vm342_vm1, %v1148_v2, %v1143_v6 }
 0x10e   : > { %v1084_v14 = vpack.c.bf16 %v350_v11, %v349_v10  ;;  %v1159_v15 = vunpack.i.h.bf16 %v1157_v12  ;;  %v1158_v16 = vunpack.i.l.bf16 %v1157_v12  ;;  %v1152_v17 = vpop.permute.xlu0 %1151  ;;  %v344_v18 = vsel %vm342_vm1, %v1149_v1, %v1144_v5 }
 0x10f   : > { %v1154_v20 = vunpack.i.h.bf16 %v1152_v17  ;;  %v1153_v21 = vunpack.i.l.bf16 %v1152_v17  ;;  %v1087_v22 = vpack.c.bf16 %v344_v18, %v343_v13 }
 0x110   : > { %1086 = vmatpush1.bf16.msk.msra.mxu0 %vm1085_vm4, %v1084_v14 }
 0x111   : > { %1088 = vmatprep.subr.bf16.mxu1 %v1087_v22  ;;  %v1167_v25 = vpop.permute.xlu1 %1166  ;;  %v708_v26 = vsel %vm705_vm3, %v1153_v21, %v1158_v16  ;;  %v709_v27 = vsel %vm705_vm3, %v1154_v20, %v1159_v15 }
 0x112   : > { %1090 = vmatpush1.bf16.msra.mxu1 %v1089_v9  ;;  %v1169_v28 = vunpack.i.h.bf16 %v1167_v25  ;;  %v1168_v29 = vunpack.i.l.bf16 %v1167_v25  ;;  %v1162_v30 = vpop.permute.xlu0 %1161  ;;  %v1091_v31 = vpack.c.bf16 %v709_v27, %v708_v26 }
 0x113   : > { %v1164_v32 = vunpack.i.h.bf16 %v1162_v30  ;;  %v1163_v33 = vunpack.i.l.bf16 %v1162_v30  ;;  %1057 = vmatmul.mubr.msk.f32.vlgmr.msra.gmra.mrb[0].mxu0 %vm368_vm0, %v363_v24 }
 0x114   : > { %v706_v34 = vsel %vm705_vm3, %v1158_v16, %v1168_v29  ;;  %v707_v35 = vsel %vm705_vm3, %v1159_v15, %v1169_v28  ;;  %1092 = vmatprep.subr.bf16.mxu0 %v1091_v31  ;;  %605 = vmatprep.mubr.f32.mxu0 %v1179_v19 }
 0x115   : > { %v713_v37 = vsel %vm705_vm3, %v1169_v28, %v1164_v32  ;;  %v710_v38 = vsel %vm705_vm3, %v1163_v33, %v1153_v21  ;;  %v711_v39 = vsel %vm705_vm3, %v1164_v32, %v1154_v20  ;;  %1059 = vmatmul.mubr.msk.f32.vlgmr.msra.gmra.mrb[0].mxu1 %vm368_vm0, %v363_v24  ;;  %v1098_v40 = vpack.c.bf16 %v707_v35, %v706_v34 }
 0x116   : > { %v712_v41 = vsel %vm705_vm3, %v1168_v29, %v1163_v33  ;;  %v1093_v42 = vpack.c.bf16 %v711_v39, %v710_v38  ;;  %682 = vmatprep.mubr.f32.mxu1 %v1179_v19 }
 0x117   : > { %v1095_v43 = vpack.c.bf16 %v713_v37, %v712_v41  ;;  %1058 = vmatmul.mubr.msk.f32.gmra.mrb[2].mxu0 %vm368_vm0, %v364_v36 }
 0x118   : > { %1094 = vmatpush1.bf16.msra.mxu0 %v1093_v42  ;;  %799 = vmatprep.mubr.f32.mxu0 %v1179_v19 }
 0x119   : > { %1060 = vmatmul.mubr.msk.f32.gmra.mrb[2].mxu1 %vm368_vm0, %v364_v36  ;;  %1097 = vmatprep.subr.msk.bf16.mxu1 %vm1096_vm6, %v1095_v43 }
 0x11a   : > { %1099 = vmatpush1.bf16.msra.mxu1 %v1098_v40  ;;  %876 = vmatprep.mubr.f32.mxu1 %v1179_v19 }
 0x11b   : > { %1063 = vmatmul.mubr.msk.f32.vlgmr.msra.gmra.mrb[0].mxu0 %vm368_vm0, %v1061_v44 }
 0x11c   : > { %805 = vmatprep.mubr.f32.mxu0 %v1179_v19 }
 0x11d   : > { %1067 = vmatmul.mubr.msk.f32.vlgmr.msra.gmra.mrb[0].mxu1 %vm368_vm0, %v1061_v44 }
 0x11e   : > { %882 = vmatprep.mubr.f32.mxu1 %v1179_v19 }
 0x11f   : > { %1064 = vmatmul.mubr.msk.f32.gmra.mrb[2].mxu0 %vm368_vm0, %v1062_v45 }
 0x121   : > { %1068 = vmatmul.mubr.msk.f32.gmra.mrb[2].mxu1 %vm368_vm0, %v1062_v45 }
 0x122   : > { %v907_v55 = vpop.permute.xlu1 %906 }
 0x123   : > { %v902_v46 = vpop.permute.xlu0 %901 }
 0x1ee   : > { %v801_v47 = vpop.f32.mrb[0].mxu0 }
 0x1ef   : > { %v909_v48 = vadd.f32 %v902_v46, %v801_v47  ;;  %v803_v49 = vpop.f32.mrb[1].mxu0 }
 0x1f0   : > { %v910_v50 = vadd.f32 %v902_v46, %v803_v49  ;;  %v878_v51 = vpop.f32.mrb[0].mxu1 }
 0x1f1   : > { %v930_v52 = vmul.f32 %v909_v48, %v909_v48  ;;  %v911_v53 = vadd.f32 %v902_v46, %v878_v51  ;;  %v880_v54 = vpop.f32.mrb[1].mxu1 }
 0x1f2   : > { %v917_v56 = vadd.f32 %v910_v50, %v909_v48  ;;  %v931_v57 = vmul.f32 %v910_v50, %v910_v50  ;;  %v807_v58 = vpop.f32.mrb[2].mxu0  ;;  %v912_v59 = vadd.f32 %v902_v46, %v880_v54 }
 0x1f3   : > { %v913_v60 = vadd.f32 %v907_v55, %v807_v58  ;;  %v809_v19 = vpop.f32.mrb[3].mxu0  ;;  %v932_v1 = vmul.f32 %v911_v53, %v911_v53 }
 0x1f4   : > { %v938_v61 = vadd.f32 %v931_v57, %v930_v52  ;;  %v918_v62 = vadd.f32 %v917_v56, %v911_v53  ;;  %v914_v63 = vadd.f32 %v907_v55, %v809_v19  ;;  %v884_v0 = vpop.f32.mrb[2].mxu1  ;;  %v933_v9 = vmul.f32 %v912_v59, %v912_v59 }
 0x1f5   : > { %v934_v2 = vmul.f32 %v913_v60, %v913_v60  ;;  %v915_v3 = vadd.f32 %v907_v55, %v884_v0  ;;  %v886_v4 = vpop.f32.mrb[3].mxu1 }
 0x1f6   : > { %v922_v5 = vadd.f32 %v914_v63, %v913_v60  ;;  %v935_v6 = vmul.f32 %v914_v63, %v914_v63  ;;  %v916_v7 = vadd.f32 %v907_v55, %v886_v4  ;;  %v919_v8 = vadd.f32 %v918_v62, %v912_v59 }
 0x1f7   : > { %v939_v10 = vadd.f32 %v938_v61, %v932_v1  ;;  %v936_v13 = vmul.f32 %v915_v3, %v915_v3 }
 0x1f8   : > { %v943_v11 = vadd.f32 %v935_v6, %v934_v2  ;;  %v923_v12 = vadd.f32 %v922_v5, %v915_v3  ;;  %920 = vadd.xlane.f32.xlu0 %v919_v8  ;;  %v937_v15 = vmul.f32 %v916_v7, %v916_v7 }
 0x1f9   : > { %v940_v14 = vadd.f32 %v939_v10, %v933_v9 }
 0x1fa   : > { %v924_v16 = vadd.f32 %v923_v12, %v916_v7  ;;  %v944_v17 = vadd.f32 %v943_v11, %v936_v13 }
 0x1fc   : > { %941 = vadd.xlane.f32.xlu0 %v940_v14  ;;  %925 = vadd.xlane.f32.xlu1 %v924_v16  ;;  %v945_v18 = vadd.f32 %v944_v17, %v937_v15 }
 0x200   : > { %946 = vadd.xlane.f32.xlu0 %v945_v18 }
 0x285   : > { %v921_v20 = vpop.xlane.xlu0 %920 }
 0x286   : > { %928 = vst.msk [vmem:[%s259_s10] sm:$0xff] %vm927_vm7, %v921_v20 }
 0x289   : > { %v942_v21 = vpop.xlane.xlu0 %941  ;;  %v926_v22 = vpop.xlane.xlu1 %925 }
 0x28a   : > { %948 = vst.msk [vmem:[%s264_s13] sm:$0xff] %vm927_vm7, %v942_v21  ;;  %929 = vst.msk [vmem:[%s259_s10 + $0x8] sm:$0xff] %vm927_vm7, %v926_v22 }
 0x28d   : > { %v947_v23 = vpop.xlane.xlu0 %946 }
 0x28e   : > { %949 = vst.msk [vmem:[%s264_s13 + $0x8] sm:$0xff] %vm927_vm7, %v947_v23 }
 0x28f PF: > { %s17_s21 = sadd.s32 1, %s1176_s21  }
 0x290   : > { %p14_p4 = scmp.ge.s32.totalorder %s17_s21, 6  }
 0x292   :  { %16 = sbr.rel (!%p14_p4) target bundleno = 1 (0x1), region = 84 }

// kernel: resnet_forward.5
= control target key start
LH: loop header
LB: loop body
LE: loop exit
PB: predicated region body
PF: predicated region fallthrough
CT: control target
= control target key end

     0   :  { %14 = vsyncpa [#allocation3], 0  ;;  %s2450_s0 = inlined_call_operand.vmem [shape: f32[4,16,512], index: 0, kind: input, shape index: {}]   ;;  %s2451_s1 = inlined_call_operand.vmem [shape: f32[16,1], index: 1, kind: input, shape index: {}]   ;;  %s2452_s2 = inlined_call_operand.vmem [shape: f32[16,1], index: 2, kind: input, shape index: {}]   ;;  %s2453_s3 = inlined_call_operand.vmem [shape: f32[3,16,16], index: 3, kind: input, shape index: {}]   ;;  %s2454_s4 = inlined_call_operand.vmem [shape: f32[16,1], index: 4, kind: input, shape index: {}]   ;;  %s2455_s5 = inlined_call_operand.vmem [shape: f32[16,1], index: 5, kind: input, shape index: {}]   ;;  %s2456_s6 = inlined_call_operand.vmem [shape: f32[16,1], index: 6, kind: input, shape index: {}]   ;;  %s2457_s7 = inlined_call_operand.vmem [shape: f32[3,16,16], index: 7, kind: input, shape index: {}]   ;;  %s2458_s8 = inlined_call_operand.vmem [shape: f32[16,1], index: 8, kind: input, shape index: {}]   ;;  %s2459_s9 = inlined_call_operand.hbm [shape: f32[4,16,512], index: 9, kind: output, shape index: {}]  }
   0x1   :  { %16 = vsyncpa [#allocation3 + $0x1], 0  ;;  %s2089_s30 = smov 0   ;;  %s2091_s10 = smov 0  }
   0x2   :  { %s2093_s11 = smov 0   ;;  %s2095_s12 = smov 0  }
   0x3 LB: > { %s2110_s13 = sadd.s32 4294967295, %s2030_s12   ;;  %s1703_s14 = sadd.s32 4294967294, %s2030_s12   ;;  %s2030_s12 = sphi %s2095_s12, %s2469_s12   ;;  %s2026_s11 = sphi %s2093_s11, %s2468_s11   ;;  %s2022_s10 = sphi %s2091_s10, %s2467_s10   ;;  %s2018_s30 = sphi %s2089_s30, %s2466_s30  }
   0x4   : > { %s2114_s15 = sadd.s32 1, %s2030_s12   ;;  %s223_s16 = sadd.s32 1, %s2026_s11 }
   0x5   : > { %s220_s17 = ssub.s32 %s2030_s12, %s2114_s15  ;;  %p233_p0 = scmp.ne.s32.totalorder %s2026_s11, %s2022_s10 }
   0x6   : > { %p221_p1 = scmp.eq.s32.totalorder %s220_s17, 0  ;;  %p234_p2 = scmp.eq.s32.totalorder %s2110_s13, 3 }
   0x7   : > { %p239_p3 = scmp.ne.s32.totalorder %s2022_s10, %s2018_s30  ;;  %p240_p4 = scmp.eq.s32.totalorder %s1703_s14, 3 }
   0x8   : > { %s2125_s18 = scalar_select %p221_p1, %s2026_s11, %s223_s16  }
   0x9   : > { %p2127_p5 = por %p234_p2, %p233_p0  ;;  %p2131_p6 = por %p240_p4, %p239_p3 }
   0xa   : > { %p1706_p7 = scmp.ge.s32.totalorder %s2030_s12, 1  ;;  %p290_p8 = scmp.lt.s32.totalorder %s2030_s12, 5 }
   0xc   : > { %p291_p9 = pnand %p1706_p7, %p290_p8 }
   0xd   : > { %v359_v0 = vld [vmem:[%s2452_s2] sm:$0xff] (!%p291_p9)  ;;  %v2032_v2 = vmov (!%p291_p9), 0   ;;  %v360_v3 = vld [vmem:[%s2452_s2 + $0x8] sm:$0xff] (!%p291_p9)  ;;  %p326_p10 = scmp.lt.s32.totalorder (!%p291_p9), %s2110_s13, 3  ;;  %v2033_v33 = vmov (!%p291_p9), 0.0   ;;  %s2034_s22 = smov (!%p291_p9), 1   ;;  %v387_v58 = vlaneseq (!%p291_p9) }
   0xe   : > { %294 = sbr.rel (%p291_p9) target bundleno = 893 (0x37d), region = 56  ;;  %v339_v1 = vld [vmem:[%s2451_s1] sm:$0xff] (!%p291_p9)  ;;  %1887 = vset.pattern.permute.xlu1 (!%p291_p9), %v2032_v2  ;;  %1886 = vset.pattern.permute.xlu0 (!%p291_p9), %v2032_v2  ;;  %v340_v4 = vld [vmem:[%s2451_s1 + $0x8] sm:$0xff] (!%p291_p9)  ;;  %v1710_v49 = vld [vmem:[%s2453_s3 + $0x10] sm:$0xff] (!%p291_p9)  ;;  %vm434_vm0 = vcmask (!%p291_p9), 130048   ;;  %s2035_s27 = smov (!%p291_p9), 127  }
   0xf   : > { %363 = vperm.xlu1 (!%p291_p9), %1887, %v359_v0   ;;  %343 = vperm.xlu0 (!%p291_p9), %1886, %v339_v1   ;;  %v1711_v51 = vld [vmem:[%s2453_s3 + $0x18] sm:$0xff] (!%p291_p9)  ;;  %v964_v52 = vld [vmem:[%s2454_s4 + $0x8] sm:$0xff] (!%p291_p9)  ;;  %v963_v53 = vld [vmem:[%s2454_s4] sm:$0xff] (!%p291_p9)  ;;  %v2220_v59 = vand.u32 (!%p291_p9), 127, %v387_v58  ;;  %s1756_s23 = sshll.u32 (!%p291_p9), %s2110_s13, 10 }
  0x10   : > { %505 = vmatprep.mubr.f32.mxu0 (!%p291_p9), %v2033_v33  ;;  %582 = vmatprep.mubr.f32.mxu1 (!%p291_p9), %v2033_v33  ;;  %v984_v54 = vld [vmem:[%s2455_s5 + $0x8] sm:$0xff] (!%p291_p9)  ;;  %v983_v55 = vld [vmem:[%s2455_s5] sm:$0xff] (!%p291_p9) }
  0x11   : > { %v1004_v56 = vld [vmem:[%s2456_s6 + $0x8] sm:$0xff] (!%p291_p9)  ;;  %v1003_v57 = vld [vmem:[%s2456_s6] sm:$0xff] (!%p291_p9)  ;;  %vm408_vm1 = vcmp.lt.s32.totalorder (!%p291_p9), %v2220_v59, 1  ;;  %vm417_vm2 = vcmp.ge.s32.totalorder (!%p291_p9), %v2220_v59, 1  ;;  %vm771_vm4 = vcmp.lt.s32.totalorder (!%p291_p9), %v2220_v59, 127 }
  0x12   : > { %vm2232_vm3 = vmpackc.low (!%p291_p9), %vm417_vm2, %vm417_vm2  ;;  %v1722_v58 = vld [vmem:[%s2453_s3 + $0x20] sm:$0xff] (!%p291_p9) }
  0x13   : > { %368 = vperm.xlu1 (!%p291_p9), %1887, %v360_v3   ;;  %348 = vperm.xlu0 (!%p291_p9), %1886, %v340_v4  }
  0x15   : > { %s327_s29 = scalar_select %p326_p10, %s2110_s13, 3 }
  0x16   : > { %s2402_s13 = scalar_lea.hbm %s2459_s9, %s1756_s23 }
  0x17   : > { %s1755_s14 = sshll.u32 %s327_s29, 6  ;;  %s2036_s29 = smov [#allocation2]  }
  0x18   : > { %s330_s21 = scalar_lea.vmem %s2450_s0, %s1755_s14  ;;  %s1972_s14 = sshll.u32 %s2036_s29, 4  ;;  %s1973_s14 = int_to_ptr.vmem [resolvable:$false] %s1972_s14 }
  0x19   : > { %v2154_v5 = vld [vmem:[%s330_s21] sm:$0xff]  ;;  %v2156_v6 = vld [vmem:[%s330_s21 + $0x8] sm:$0xff]  ;;  %v2158_v7 = vld [vmem:[%s330_s21 + $0x10] sm:$0xff]  ;;  %s1974_s16 = scalar_lea.vmem %s1973_s14, 2048 }
  0x1a   : > { %v2160_v8 = vld [vmem:[%s330_s21 + $0x18] sm:$0xff]  ;;  %v2166_v15 = vld [vmem:[%s330_s21 + $0x20] sm:$0xff]  ;;  %v2168_v16 = vld [vmem:[%s330_s21 + $0x28] sm:$0xff] }
  0x1b   : > { %v2170_v17 = vld [vmem:[%s330_s21 + $0x30] sm:$0xff]  ;;  %v2172_v18 = vld [vmem:[%s330_s21 + $0x38] sm:$0xff] }
  0x8e   : > { %v364_v9 = vpop.permute.xlu1 %363  ;;  %v344_v10 = vpop.permute.xlu0 %343 }
  0x8f   : > { %v351_v11 = vmul.f32 %v344_v10, %v2154_v5  ;;  %v352_v12 = vmul.f32 %v344_v10, %v2156_v6  ;;  %v353_v13 = vmul.f32 %v344_v10, %v2158_v7  ;;  %v354_v14 = vmul.f32 %v344_v10, %v2160_v8 }
  0x91   : > { %v371_v20 = vadd.f32 %v364_v9, %v351_v11  ;;  %v372_v21 = vadd.f32 %v364_v9, %v352_v12  ;;  %v374_v27 = vadd.f32 %v364_v9, %v354_v14  ;;  %v373_v28 = vadd.f32 %v364_v9, %v353_v13 }
  0x92   : > { %v349_v19 = vpop.permute.xlu0 %348  ;;  %v369_v24 = vpop.permute.xlu1 %368 }
  0x93   : > { %v355_v22 = vmul.f32 %v349_v19, %v2166_v15  ;;  %v356_v23 = vmul.f32 %v349_v19, %v2168_v16  ;;  %v357_v25 = vmul.f32 %v349_v19, %v2170_v17  ;;  %v358_v26 = vmul.f32 %v349_v19, %v2172_v18 }
  0x94   : > { %v379_v34 = vmax.f32 %v371_v20, 0.0  ;;  %v380_v35 = vmax.f32 %v372_v21, 0.0  ;;  %v382_v38 = vmax.f32 %v374_v27, 0.0  ;;  %v381_v40 = vmax.f32 %v373_v28, 0.0 }
  0x95   : > { %v375_v29 = vadd.f32 %v369_v24, %v355_v22  ;;  %v376_v30 = vadd.f32 %v369_v24, %v356_v23  ;;  %v378_v31 = vadd.f32 %v369_v24, %v358_v26  ;;  %v377_v32 = vadd.f32 %v369_v24, %v357_v25 }
  0x96   : > { %v391_v22 = vadd.s32 384, %v2220_v59  ;;  %v1742_v59 = vld [vmem:[%s2457_s7 + $0x20] sm:$0xff] }
  0x97   : > { %v383_v36 = vmax.f32 %v375_v29, 0.0  ;;  %v384_v37 = vmax.f32 %v376_v30, 0.0  ;;  %v386_v39 = vmax.f32 %v378_v31, 0.0  ;;  %v385_v41 = vmax.f32 %v377_v32, 0.0  ;;  %v429_v32 = vld [vmem:[%s2453_s3] sm:$0xff] }
  0x98   : > { %vm783_vm5 = vcmp.lt.s32.totalorder %v391_v22, 511 }
  0x99   : > { %v1893_v42 = vpack.i.bf16 %v384_v37, %v380_v35  ;;  %v1757_v43 = vpack.c.bf16 %v384_v37, %v380_v35  ;;  %v1888_v44 = vpack.i.bf16 %v383_v36, %v379_v34  ;;  %v1759_v45 = vpack.c.bf16 %v383_v36, %v379_v34  ;;  %vm2264_vm6 = vmpackc.low %vm783_vm5, %vm783_vm5 }
  0x9a   : > { %v1761_v46 = vpack.c.bf16 %v386_v39, %v382_v38  ;;  %v1763_v47 = vpack.c.bf16 %v385_v41, %v381_v40  ;;  %v1903_v48 = vpack.i.bf16 %v386_v39, %v382_v38  ;;  %v1898_v50 = vpack.i.bf16 %v385_v41, %v381_v40 }
  0x9b   : > { %1894 = vrot.lane.b32.xlu1 %v1893_v42, %s2034_s22  ;;  %1758 = vmatprep.subr.bf16.mxu0 %v1757_v43 }
  0x9c   : > { %1762 = vmatprep.subr.bf16.mxu1 %v1761_v46  ;;  %1889 = vrot.lane.b32.xlu0 %v1888_v44, %s2034_s22 }
  0x9d   : > { %1760 = vmatpush1.bf16.msra.mxu0 %v1759_v45  ;;  %1764 = vmatpush1.bf16.msra.mxu1 %v1763_v47 }
  0x9f   : > { %1904 = vrot.lane.b32.xlu1 %v1903_v48, %s2034_s22 }
  0xa0   : > { %1899 = vrot.lane.b32.xlu0 %v1898_v50, %s2034_s22  ;;  %1712 = vmatmul.mubr.msk.f32.vlgmr.msra.gmra.mrb[0].mxu0 %vm434_vm0, %v1710_v49 }
  0xa1   : > { %1714 = vmatmul.mubr.msk.f32.vlgmr.msra.gmra.mrb[0].mxu1 %vm434_vm0, %v1710_v49  ;;  %511 = vmatprep.mubr.f32.mxu0 %v2033_v33  ;;  %v1743_v49 = vld [vmem:[%s2457_s7 + $0x28] sm:$0xff] }
  0xa2   : > { %588 = vmatprep.mubr.f32.mxu1 %v2033_v33 }
  0xa3   : > { %1914 = vrot.lane.b32.xlu1 %v1893_v42, %s2035_s27 }
  0xa4   : > { %1909 = vrot.lane.b32.xlu0 %v1888_v44, %s2035_s27  ;;  %1713 = vmatmul.mubr.msk.f32.gmra.mrb[2].mxu0 %vm434_vm0, %v1711_v51  ;;  %v430_v44 = vld [vmem:[%s2453_s3 + $0x8] sm:$0xff] }
  0xa5   : > { %1715 = vmatmul.mubr.msk.f32.gmra.mrb[2].mxu1 %vm434_vm0, %v1711_v51  ;;  %665 = vmatprep.mubr.f32.mxu0 %v2033_v33 }
  0xa6   : > { %742 = vmatprep.mubr.f32.mxu1 %v2033_v33 }
  0xa7   : > { %1924 = vrot.lane.b32.xlu1 %v1903_v48, %s2035_s27 }
  0xa8   : > { %1919 = vrot.lane.b32.xlu0 %v1898_v50, %s2035_s27 }
  0xab   : > { %972 = vperm.xlu1 %1887, %v964_v52  }
  0xac   : > { %967 = vperm.xlu0 %1886, %v963_v53  }
  0xaf   : > { %992 = vperm.xlu1 %1887, %v984_v54  }
  0xb0   : > { %987 = vperm.xlu0 %1886, %v983_v55  }
  0xb3   : > { %1012 = vperm.xlu1 %1887, %v1004_v56  }
  0xb4   : > { %1007 = vperm.xlu0 %1886, %v1003_v57  }
 0x10d   : > { %v1895_v60 = vpop.permute.xlu1 %1894 }
 0x10e   : > { %v1897_v61 = vunpack.i.h.bf16 %v1895_v60  ;;  %v1896_v62 = vunpack.i.l.bf16 %v1895_v60  ;;  %v1890_v63 = vpop.permute.xlu0 %1889  ;;  %v1723_v60 = vld [vmem:[%s2453_s3 + $0x28] sm:$0xff] }
 0x10f   : > { %v1892_v0 = vunpack.i.h.bf16 %v1890_v63  ;;  %v1891_v1 = vunpack.i.l.bf16 %v1890_v63 }
 0x111   : > { %v1905_v2 = vpop.permute.xlu1 %1904  ;;  %v413_v3 = vsel %vm408_vm1, %v1891_v1, %v1896_v62  ;;  %v414_v4 = vsel %vm408_vm1, %v1892_v0, %v1897_v61 }
 0x112   : > { %v1907_v9 = vunpack.i.h.bf16 %v1905_v2  ;;  %v1906_v10 = vunpack.i.l.bf16 %v1905_v2  ;;  %v1900_v11 = vpop.permute.xlu0 %1899  ;;  %v1765_v12 = vpack.c.bf16 %v414_v4, %v413_v3 }
 0x113   : > { %v1902_v13 = vunpack.i.h.bf16 %v1900_v11  ;;  %v1901_v14 = vunpack.i.l.bf16 %v1900_v11 }
 0x114   : > { %v415_v19 = vsel %vm408_vm1, %v1906_v10, %v1891_v1  ;;  %v416_v20 = vsel %vm408_vm1, %v1907_v9, %v1892_v0  ;;  %1766 = vmatprep.subr.bf16.mxu0 %v1765_v12 }
 0x115   : > { %v1767_v23 = vpack.c.bf16 %v416_v20, %v415_v19  ;;  %v412_v24 = vsel %vm408_vm1, %v1897_v61, %v1902_v13  ;;  %v411_v25 = vsel %vm408_vm1, %v1896_v62, %v1901_v14  ;;  %v1915_v26 = vpop.permute.xlu1 %1914  ;;  %v409_v27 = vsel %vm408_vm1, %v1901_v14, %v1906_v10 }
 0x116   : > { %v1772_v28 = vpack.c.bf16 %v412_v24, %v411_v25  ;;  %v1910_v29 = vpop.permute.xlu0 %1909  ;;  %v410_v30 = vsel %vm408_vm1, %v1902_v13, %v1907_v9  ;;  %v1917_v34 = vunpack.i.h.bf16 %v1915_v26  ;;  %v1916_v35 = vunpack.i.l.bf16 %v1915_v26 }
 0x117   : > { %1769 = vmatpush1.bf16.msk.msra.mxu0 %vm2232_vm3, %v1767_v23  ;;  %v1770_v31 = vpack.c.bf16 %v410_v30, %v409_v27  ;;  %v1912_v36 = vunpack.i.h.bf16 %v1910_v29  ;;  %v1911_v37 = vunpack.i.l.bf16 %v1910_v29 }
 0x119   : > { %1771 = vmatprep.subr.bf16.mxu1 %v1770_v31  ;;  %v1925_v38 = vpop.permute.xlu1 %1924  ;;  %v777_v45 = vsel %vm771_vm4, %v1912_v36, %v1917_v34  ;;  %v776_v46 = vsel %vm771_vm4, %v1911_v37, %v1916_v35 }
 0x11a   : > { %1773 = vmatpush1.bf16.msra.mxu1 %v1772_v28  ;;  %v1927_v39 = vunpack.i.h.bf16 %v1925_v38  ;;  %v1926_v40 = vunpack.i.l.bf16 %v1925_v38  ;;  %v1920_v41 = vpop.permute.xlu0 %1919  ;;  %1718 = vmatmul.mubr.msk.f32.vlgmr.msra.gmra.mrb[0].mxu0 %vm434_vm0, %v429_v32  ;;  %v1776_v57 = vpack.c.bf16 %v777_v45, %v776_v46 }
 0x11b   : > { %v1922_v42 = vunpack.i.h.bf16 %v1920_v41  ;;  %v1921_v43 = vunpack.i.l.bf16 %v1920_v41  ;;  %671 = vmatprep.mubr.f32.mxu0 %v2033_v33 }
 0x11c   : > { %v778_v47 = vsel %vm771_vm4, %v1926_v40, %v1911_v37  ;;  %v779_v48 = vsel %vm771_vm4, %v1927_v39, %v1912_v36 }
 0x11d   : > { %v1778_v50 = vpack.c.bf16 %v779_v48, %v778_v47  ;;  %v773_v51 = vsel %vm771_vm4, %v1922_v42, %v1927_v39  ;;  %v772_v52 = vsel %vm771_vm4, %v1921_v43, %v1926_v40  ;;  %1720 = vmatmul.mubr.msk.f32.vlgmr.msra.gmra.mrb[0].mxu1 %vm434_vm0, %v429_v32  ;;  %v774_v53 = vsel %vm771_vm4, %v1916_v35, %v1921_v43 }
 0x11e   : > { %v1781_v54 = vpack.c.bf16 %v773_v51, %v772_v52  ;;  %748 = vmatprep.mubr.f32.mxu1 %v2033_v33  ;;  %1719 = vmatmul.mubr.msk.f32.gmra.mrb[2].mxu0 %vm434_vm0, %v430_v44  ;;  %v775_v55 = vsel %vm771_vm4, %v1917_v34, %v1922_v42 }
 0x11f   : > { %v1774_v56 = vpack.c.bf16 %v775_v55, %v774_v53  ;;  %1780 = vmatprep.subr.msk.bf16.mxu1 %vm2264_vm6, %v1778_v50  ;;  %865 = vmatprep.mubr.f32.mxu0 %v2033_v33 }
 0x120   : > { %1782 = vmatpush1.bf16.msra.mxu1 %v1781_v54 }
 0x121   : > { %1721 = vmatmul.mubr.msk.f32.gmra.mrb[2].mxu1 %vm434_vm0, %v430_v44  ;;  %1775 = vmatprep.subr.bf16.mxu0 %v1774_v56 }
 0x122   : > { %1777 = vmatpush1.bf16.msra.mxu0 %v1776_v57  ;;  %942 = vmatprep.mubr.f32.mxu1 %v2033_v33 }
 0x125   : > { %1724 = vmatmul.mubr.msk.f32.vlgmr.msra.gmra.mrb[0].mxu0 %vm434_vm0, %v1722_v58  ;;  %1728 = vmatmul.mubr.msk.f32.vlgmr.msra.gmra.mrb[0].mxu1 %vm434_vm0, %v1722_v58 }
 0x126   : > { %871 = vmatprep.mubr.f32.mxu0 %v2033_v33  ;;  %948 = vmatprep.mubr.f32.mxu1 %v2033_v33 }
 0x129   : > { %1725 = vmatmul.mubr.msk.f32.gmra.mrb[2].mxu0 %vm434_vm0, %v1723_v60  ;;  %1729 = vmatmul.mubr.msk.f32.gmra.mrb[2].mxu1 %vm434_vm0, %v1723_v60 }
 0x12a   : > { %1138 = vmatprep.mubr.f32.mxu0 %v2033_v33  ;;  %1215 = vmatprep.mubr.f32.mxu1 %v2033_v33  ;;  %v973_v62 = vpop.permute.xlu1 %972 }
 0x12b   : > { %v968_v61 = vpop.permute.xlu0 %967 }
 0x12e   : > { %v993_v10 = vpop.permute.xlu1 %992 }
 0x12f   : > { %v988_v63 = vpop.permute.xlu0 %987 }
 0x132   : > { %v1013_v36 = vpop.permute.xlu1 %1012 }
 0x133   : > { %v1008_v28 = vpop.permute.xlu0 %1007 }
 0x1f8   : > { %v867_v0 = vpop.f32.mrb[0].mxu0  ;;  %v944_v1 = vpop.f32.mrb[0].mxu1 }
 0x1f9   : > { %v975_v2 = vadd.f32 %v968_v61, %v867_v0  ;;  %v977_v3 = vadd.f32 %v968_v61, %v944_v1  ;;  %v869_v4 = vpop.f32.mrb[1].mxu0  ;;  %v946_v9 = vpop.f32.mrb[1].mxu1  ;;  %v1731_v0 = vld [vmem:[%s2457_s7 + $0x18] sm:$0xff]  ;;  %v1591_v1 = vld [vmem:[%s2458_s8] sm:$0xff] }
 0x1fa   : > { %v976_v11 = vadd.f32 %v968_v61, %v869_v4  ;;  %v978_v12 = vadd.f32 %v968_v61, %v946_v9 }
 0x1fb   : > { %v995_v13 = vmul.f32 %v988_v63, %v975_v2  ;;  %v997_v14 = vmul.f32 %v988_v63, %v977_v3  ;;  %v1592_v2 = vld [vmem:[%s2458_s8 + $0x8] sm:$0xff] }
 0x1fc   : > { %v996_v19 = vmul.f32 %v988_v63, %v976_v11  ;;  %v998_v20 = vmul.f32 %v988_v63, %v978_v12  ;;  %v873_v22 = vpop.f32.mrb[2].mxu0  ;;  %v950_v23 = vpop.f32.mrb[2].mxu1  ;;  %v1730_v63 = vld [vmem:[%s2457_s7 + $0x10] sm:$0xff] }
 0x1fd   : > { %v979_v24 = vadd.f32 %v973_v62, %v873_v22  ;;  %v981_v25 = vadd.f32 %v973_v62, %v950_v23  ;;  %v875_v26 = vpop.f32.mrb[3].mxu0  ;;  %v952_v27 = vpop.f32.mrb[3].mxu1  ;;  %v1015_v31 = vadd.f32 %v1008_v28, %v995_v13  ;;  %v1017_v32 = vadd.f32 %v1008_v28, %v997_v14 }
 0x1fe   : > { %v980_v29 = vadd.f32 %v973_v62, %v875_v26  ;;  %v982_v30 = vadd.f32 %v973_v62, %v952_v27  ;;  %v1016_v37 = vadd.f32 %v1008_v28, %v996_v19  ;;  %v1018_v38 = vadd.f32 %v1008_v28, %v998_v20 }
 0x1ff   : > { %v999_v34 = vmul.f32 %v993_v10, %v979_v24  ;;  %v1001_v35 = vmul.f32 %v993_v10, %v981_v25  ;;  %v1023_v45 = vmax.f32 %v1015_v31, 0.0  ;;  %v1025_v46 = vmax.f32 %v1017_v32, 0.0 }
 0x200   : > { %v1000_v39 = vmul.f32 %v993_v10, %v980_v29  ;;  %v1002_v40 = vmul.f32 %v993_v10, %v982_v30  ;;  %v1024_v50 = vmax.f32 %v1016_v37, 0.0  ;;  %v1026_v51 = vmax.f32 %v1018_v38, 0.0 }
 0x201   : > { %v1019_v41 = vadd.f32 %v1013_v36, %v999_v34  ;;  %v1021_v42 = vadd.f32 %v1013_v36, %v1001_v35 }
 0x202   : > { %v1020_v43 = vadd.f32 %v1013_v36, %v1000_v39  ;;  %v1022_v44 = vadd.f32 %v1013_v36, %v1002_v40 }
 0x203   : > { %v1027_v47 = vmax.f32 %v1019_v41, 0.0  ;;  %v1029_v48 = vmax.f32 %v1021_v42, 0.0 }
 0x204   : > { %v1028_v52 = vmax.f32 %v1020_v43, 0.0  ;;  %v1030_v53 = vmax.f32 %v1022_v44, 0.0  ;;  %v1063_v43 = vld [vmem:[%s2457_s7] sm:$0xff] }
 0x205   : > { %v1928_v54 = vpack.i.bf16 %v1027_v47, %v1023_v45  ;;  %v1785_v55 = vpack.c.bf16 %v1027_v47, %v1023_v45  ;;  %v1789_v56 = vpack.c.bf16 %v1029_v48, %v1025_v46  ;;  %v1933_v57 = vpack.i.bf16 %v1029_v48, %v1025_v46 }
 0x206   : > { %v1787_v58 = vpack.c.bf16 %v1030_v53, %v1026_v51  ;;  %v1948_v60 = vpack.i.bf16 %v1028_v52, %v1024_v50  ;;  %v1783_v61 = vpack.c.bf16 %v1028_v52, %v1024_v50  ;;  %v1953_v62 = vpack.i.bf16 %v1030_v53, %v1026_v51  ;;  %v1064_v52 = vld [vmem:[%s2457_s7 + $0x8] sm:$0xff] }
 0x207   : > { %1929 = vrot.lane.b32.xlu0 %v1928_v54, %s2034_s22 }
 0x208   : > { %1788 = vmatprep.subr.bf16.mxu1 %v1787_v58  ;;  %1949 = vrot.lane.b32.xlu1 %v1948_v60, %s2034_s22 }
 0x209   : > { %1784 = vmatprep.subr.bf16.mxu0 %v1783_v61  ;;  %1790 = vmatpush1.bf16.msra.mxu1 %v1789_v56 }
 0x20a   : > { %1786 = vmatpush1.bf16.msra.mxu0 %v1785_v55 }
 0x20b   : > { %1934 = vrot.lane.b32.xlu0 %v1933_v57, %s2034_s22 }
 0x20c   : > { %1954 = vrot.lane.b32.xlu1 %v1953_v62, %s2034_s22  ;;  %1734 = vmatmul.mubr.msk.f32.vlgmr.msra.gmra.mrb[4].mxu1 %vm434_vm0, %v1730_v63  ;;  %s323_s22 = sand.u32 1, %s2022_s10  }
 0x20d   : > { %1732 = vmatmul.mubr.msk.f32.vlgmr.msra.gmra.mrb[4].mxu0 %vm434_vm0, %v1730_v63  ;;  %1221 = vmatprep.mubr.f32.mxu1 %v2033_v33  ;;  %s1707_s17 = sshll.u32 %s323_s22, 6  ;;  %s2409_s26 = scalar_lea.sflag [#allocation3], %s323_s22 }
 0x20e   : > { %1144 = vmatprep.mubr.f32.mxu0 %v2033_v33  ;;  %s325_s21 = scalar_lea.vmem [#allocation2], %s1707_s17 }
 0x20f   : > { %1939 = vrot.lane.b32.xlu0 %v1928_v54, %s2035_s27 }
 0x210   : > { %1959 = vrot.lane.b32.xlu1 %v1948_v60, %s2035_s27  ;;  %1735 = vmatmul.mubr.msk.f32.gmra.mrb[6].mxu1 %vm434_vm0, %v1731_v0 }
 0x211   : > { %1733 = vmatmul.mubr.msk.f32.gmra.mrb[6].mxu0 %vm434_vm0, %v1731_v0  ;;  %1375 = vmatprep.mubr.f32.mxu1 %v2033_v33 }
 0x212   : > { %1298 = vmatprep.mubr.f32.mxu0 %v2033_v33 }
 0x213   : > { %1944 = vrot.lane.b32.xlu0 %v1933_v57, %s2035_s27 }
 0x214   : > { %1964 = vrot.lane.b32.xlu1 %v1953_v62, %s2035_s27  ;;  %s1641_s27 = sshll.u32 %s325_s21, 4  ;;  %s2404_s27 = int_to_ptr.vmem [resolvable:$true] %s1641_s27 }
 0x215   : > { %s1968_s28 = scalar_lea.vmem %s2404_s27, 1024  ;;  %p1975_p0 = scmp.lt.s32.totalorder %s2404_s27, %s1973_s14 }
 0x216   : > { %p1969_p11 = scmp.ne.s32.totalorder %s2404_s27, %s1968_s28  ;;  %p1976_p1 = scmp.lt.s32.totalorder %s1974_s16, %s1968_s28 }
 0x217   : > { %1595 = vperm.xlu0 %1886, %v1591_v1  }
 0x218   : > { %1600 = vperm.xlu1 %1887, %v1592_v2   ;;  %p1970_p12 = pnand %p1969_p11, %p2127_p5  ;;  %p1977_p2 = por %p1976_p1, %p1975_p0 }
 0x21a   : > { %p1971_p13 = pneg %p1970_p12 }
 0x21c   : > { %p1978_p3 = pnand %p1977_p2, %p1971_p13 }
 0x279   : > { %v1930_v3 = vpop.permute.xlu0 %1929 }
 0x27a   : > { %v1932_v4 = vunpack.i.h.bf16 %v1930_v3  ;;  %v1931_v9 = vunpack.i.l.bf16 %v1930_v3  ;;  %v1950_v10 = vpop.permute.xlu1 %1949 }
 0x27b   : > { %v1952_v11 = vunpack.i.h.bf16 %v1950_v10  ;;  %v1951_v12 = vunpack.i.l.bf16 %v1950_v10 }
 0x27d   : > { %v1935_v13 = vpop.permute.xlu0 %1934  ;;  %v1051_v14 = vsel %vm408_vm1, %v1931_v9, %v1951_v12  ;;  %v1052_v19 = vsel %vm408_vm1, %v1932_v4, %v1952_v11 }
 0x27e   : > { %v1937_v20 = vunpack.i.h.bf16 %v1935_v13  ;;  %v1936_v22 = vunpack.i.l.bf16 %v1935_v13  ;;  %v1955_v23 = vpop.permute.xlu1 %1954  ;;  %v1791_v24 = vpack.c.bf16 %v1052_v19, %v1051_v14 }
 0x27f   : > { %v1957_v25 = vunpack.i.h.bf16 %v1955_v23  ;;  %v1956_v26 = vunpack.i.l.bf16 %v1955_v23 }
 0x280   : > { %v1049_v27 = vsel %vm408_vm1, %v1951_v12, %v1936_v22  ;;  %v1050_v28 = vsel %vm408_vm1, %v1952_v11, %v1937_v20  ;;  %1792 = vmatprep.subr.bf16.mxu0 %v1791_v24 }
 0x281   : > { %v1054_v29 = vsel %vm408_vm1, %v1957_v25, %v1932_v4  ;;  %v1053_v30 = vsel %vm408_vm1, %v1956_v26, %v1931_v9  ;;  %v1940_v31 = vpop.permute.xlu0 %1939  ;;  %v1047_v32 = vsel %vm408_vm1, %v1936_v22, %v1956_v26  ;;  %v1048_v36 = vsel %vm408_vm1, %v1937_v20, %v1957_v25 }
 0x282   : > { %v1793_v34 = vpack.c.bf16 %v1054_v29, %v1053_v30  ;;  %v1960_v35 = vpop.permute.xlu1 %1959  ;;  %v1798_v37 = vpack.c.bf16 %v1050_v28, %v1049_v27  ;;  %v1796_v38 = vpack.c.bf16 %v1048_v36, %v1047_v32  ;;  %v1942_v39 = vunpack.i.h.bf16 %v1940_v31 }
 0x283   : > { %v1941_v40 = vunpack.i.l.bf16 %v1940_v31  ;;  %v1962_v41 = vunpack.i.h.bf16 %v1960_v35  ;;  %v1961_v42 = vunpack.i.l.bf16 %v1960_v35 }
 0x284   : > { %1795 = vmatpush1.bf16.msk.msra.mxu0 %vm2232_vm3, %v1793_v34  ;;  %1797 = vmatprep.subr.bf16.mxu1 %v1796_v38 }
 0x285   : > { %v1945_v44 = vpop.permute.xlu0 %1944  ;;  %1799 = vmatpush1.bf16.msra.mxu1 %v1798_v37  ;;  %v1409_v51 = vsel %vm771_vm4, %v1942_v39, %v1962_v41  ;;  %v1408_v21 = vsel %vm771_vm4, %v1941_v40, %v1961_v42 }
 0x286   : > { %v1947_v45 = vunpack.i.h.bf16 %v1945_v44  ;;  %v1946_v46 = vunpack.i.l.bf16 %v1945_v44  ;;  %v1965_v47 = vpop.permute.xlu1 %1964  ;;  %v1802_v63 = vpack.c.bf16 %v1409_v51, %v1408_v21 }
 0x287   : > { %v1967_v48 = vunpack.i.h.bf16 %v1965_v47  ;;  %v1966_v50 = vunpack.i.l.bf16 %v1965_v47  ;;  %1738 = vmatmul.mubr.msk.f32.vlgmr.msra.gmra.mrb[4].mxu0 %vm434_vm0, %v1063_v43 }
 0x288   : > { %1304 = vmatprep.mubr.f32.mxu0 %v2033_v33  ;;  %v1406_v53 = vsel %vm771_vm4, %v1961_v42, %v1946_v46  ;;  %v1407_v54 = vsel %vm771_vm4, %v1962_v41, %v1947_v45  ;;  %1740 = vmatmul.mubr.msk.f32.vlgmr.msra.gmra.mrb[4].mxu1 %vm434_vm0, %v1063_v43 }
 0x289   : > { %v1405_v55 = vsel %vm771_vm4, %v1947_v45, %v1967_v48  ;;  %v1411_v56 = vsel %vm771_vm4, %v1967_v48, %v1942_v39  ;;  %v1404_v57 = vsel %vm771_vm4, %v1946_v46, %v1966_v50  ;;  %v1410_v58 = vsel %vm771_vm4, %v1966_v50, %v1941_v40  ;;  %1381 = vmatprep.mubr.f32.mxu1 %v2033_v33 }
 0x28a   : > { %v1804_v60 = vpack.c.bf16 %v1411_v56, %v1410_v58  ;;  %v1807_v61 = vpack.c.bf16 %v1405_v55, %v1404_v57  ;;  %v1800_v62 = vpack.c.bf16 %v1407_v54, %v1406_v53 }
 0x28b   : > { %1739 = vmatmul.mubr.msk.f32.gmra.mrb[6].mxu0 %vm434_vm0, %v1064_v52 }
 0x28c   : > { %1801 = vmatprep.subr.bf16.mxu0 %v1800_v62  ;;  %1806 = vmatprep.subr.msk.bf16.mxu1 %vm2264_vm6, %v1804_v60 }
 0x28d   : > { %1741 = vmatmul.mubr.msk.f32.gmra.mrb[6].mxu1 %vm434_vm0, %v1064_v52  ;;  %1803 = vmatpush1.bf16.msra.mxu0 %v1802_v63 }
 0x28e   : > { %1808 = vmatpush1.bf16.msra.mxu1 %v1807_v61  ;;  %1493 = vmatprep.mubr.f32.mxu0 %v2033_v33 }
 0x28f   : > { %1570 = vmatprep.mubr.f32.mxu1 %v2033_v33 }
 0x290   : > { %1744 = vmatmul.mubr.msk.f32.vlgmr.msra.gmra.mrb[4].mxu0 %vm434_vm0, %v1742_v59 }
 0x291   : > { %1748 = vmatmul.mubr.msk.f32.vlgmr.msra.gmra.mrb[4].mxu1 %vm434_vm0, %v1742_v59  ;;  %1499 = vmatprep.mubr.f32.mxu0 %v2033_v33 }
 0x292   : > { %1576 = vmatprep.mubr.f32.mxu1 %v2033_v33 }
 0x294   : > { %1745 = vmatmul.mubr.msk.f32.gmra.mrb[6].mxu0 %vm434_vm0, %v1743_v49 }
 0x295   : > { %1749 = vmatmul.mubr.msk.f32.gmra.mrb[6].mxu1 %vm434_vm0, %v1743_v49 }
 0x296   : > { %v1596_v0 = vpop.permute.xlu0 %1595 }
 0x297   : > { %v1601_v33 = vpop.permute.xlu1 %1600 }
 0x363   : > { %v1495_v1 = vpop.f32.mrb[4].mxu0 }
 0x364   : > { %v1603_v2 = vadd.f32 %v1596_v0, %v1495_v1  ;;  %v1497_v3 = vpop.f32.mrb[5].mxu0  ;;  %v1572_v4 = vpop.f32.mrb[4].mxu1 }
 0x365   : > { %v1604_v9 = vadd.f32 %v1596_v0, %v1497_v3  ;;  %v1605_v10 = vadd.f32 %v1596_v0, %v1572_v4  ;;  %v1574_v11 = vpop.f32.mrb[5].mxu1 }
 0x366   : > { %v1611_v12 = vadd.f32 %v1603_v2, %v2154_v5  ;;  %v1606_v13 = vadd.f32 %v1596_v0, %v1574_v11 }
 0x367   : > { %v1612_v14 = vadd.f32 %v1604_v9, %v2156_v6  ;;  %v1613_v19 = vadd.f32 %v1605_v10, %v2158_v7  ;;  %v1501_v20 = vpop.f32.mrb[6].mxu0 }
 0x368   : > { %1619 = vst [vmem:[%s325_s21] sm:$0xff] %v1611_v12  ;;  %v1614_v22 = vadd.f32 %v1606_v13, %v2160_v8  ;;  %v1607_v23 = vadd.f32 %v1601_v33, %v1501_v20  ;;  %v1503_v24 = vpop.f32.mrb[7].mxu0  ;;  %v1578_v25 = vpop.f32.mrb[6].mxu1 }
 0x369   : > { %1620 = vst [vmem:[%s325_s21 + $0x8] sm:$0xff] %v1612_v14  ;;  %1621 = vst [vmem:[%s325_s21 + $0x10] sm:$0xff] %v1613_v19  ;;  %v1608_v5 = vadd.f32 %v1601_v33, %v1503_v24  ;;  %v1609_v26 = vadd.f32 %v1601_v33, %v1578_v25  ;;  %v1580_v27 = vpop.f32.mrb[7].mxu1 }
 0x36a   : > { %1622 = vst [vmem:[%s325_s21 + $0x18] sm:$0xff] %v1614_v22  ;;  %v1615_v6 = vadd.f32 %v1607_v23, %v2166_v15  ;;  %v1610_v7 = vadd.f32 %v1601_v33, %v1580_v27 }
 0x36b   : > { %v1616_v28 = vadd.f32 %v1608_v5, %v2168_v16  ;;  %v1617_v8 = vadd.f32 %v1609_v26, %v2170_v17 }
 0x36c   : > { %1623 = vst [vmem:[%s325_s21 + $0x20] sm:$0xff] %v1615_v6  ;;  %v1618_v29 = vadd.f32 %v1610_v7, %v2172_v18 }
 0x36d   : > { %1624 = vst [vmem:[%s325_s21 + $0x28] sm:$0xff] %v1616_v28  ;;  %1625 = vst [vmem:[%s325_s21 + $0x30] sm:$0xff] %v1617_v8 }
 0x36e   : > { %1626 = vst [vmem:[%s325_s21 + $0x38] sm:$0xff] %v1618_v29 }
 0x36f   : > { %1981 = shalt.err (!%p1978_p3)
}
 0x370   : > { %s1982_s22 = scalar_lea.hbm %s2402_s13, 1024  ;;  %s1986_s23 = scalar_lea.hbm %s2459_s9, 4096 }
 0x371   : > { %p1983_p4 = scmp.ne.s32.totalorder %s2402_s13, %s1982_s22  ;;  %p1987_p9 = scmp.lt.u32.totalorder %s2402_s13, %s2459_s9 }
 0x372   : > { %p1988_p10 = scmp.lt.u32.totalorder %s1986_s23, %s1982_s22  ;;  %p1990_p12 = scmp.lt.u32.totalorder %s1982_s22, %s2402_s13 }
 0x373   : > { %p1984_p7 = pnand %p1983_p4, %p2127_p5 }
 0x374   : > { %p1989_p11 = por %p1988_p10, %p1987_p9 }
 0x375   : > { %p1985_p8 = pneg %p1984_p7 }
 0x376   : > { %p1991_p13 = por %p1990_p12, %p1989_p11 }
 0x378   : > { %p1992_p0 = pnand %p1991_p13, %p1985_p8 }
 0x37a   : > { %1995 = shalt.err (!%p1992_p0)
}
 0x37b   : > { %s2037_s28 = smov 512   ;;  %s2038_s29 = smov 32  }
 0x37c   : > { %1841 = dma.vmem_to_hbm [thread:$0]  (%p2127_p5), %s2404_s27, 1024, %s2402_s13, %s2409_s26, %s2037_s28, %s2037_s28, %s2038_s29  }
 0x37d PF: > { %p1847_p1 = scmp.ge.s32.totalorder %s2030_s12, 2  ;;  %s1656_s14 = sand.u32 1, %s2018_s30  }
 0x37e   : > { %s1657_s16 = scalar_lea.sflag [#allocation3], %s1656_s14 }
 0x37f   : > { %p1844_p2 = pnand %p1847_p1, %p2131_p6 }
 0x381   : > { %2013 = dma.done.wait (!%p1844_p2), %s1657_s16, 1024  }
 0x382   : > { %2015 = vsyncadd (!%p1844_p2), %s1657_s16, 4294966272  ;;  %p19_p3 = scmp.ge.s32.totalorder %s2114_s15, 6   ;;  %s2466_s30 = smov %s2022_s10 }
 0x383   : > { %s2467_s10 = smov %s2026_s11  ;;  %s2468_s11 = smov %s2125_s18 }
 0x384   : > { %s2469_s12 = smov %s2114_s15  ;;  %21 = sbr.rel (!%p19_p3) target bundleno = 3 (0x3), region = 95 }
 0x38b   :  { %1662 = vsyncpa [#allocation3], 1 }
 0x38c   :  { %1664 = vsyncpa [#allocation3 + $0x1], 1 }

</bundles_post_ra>
